<compile_context>
chip_gen: v5e
topology: v5e:2x2
jax: 0.10.0
libtpu: 0.0.40
codegen_flags: <defaults>
</compile_context>

<pallas_src>
import functools

import jax
import jax.numpy as jnp
from jax.experimental import pallas as pl
from jax.experimental.pallas import tpu as pltpu


_LANE = 128


def _conv3x3_relu_kernel(body_ref, halo_ref, w_ref, b_ref, o_ref):
    """One (batch, row-strip) tile per grid step.

    body_ref: (1, TH,   Wp+2, Cp)  bf16 padded input rows [i*TH, i*TH+TH)
    halo_ref: (1, 2,    Wp+2, Cp)  bf16 padded input rows [i*TH+TH, i*TH+TH+2)
    w_ref:    (3, 3*Cp, Cp)        bf16, w_ref[dy] = [w[dy,0]; w[dy,1]; w[dy,2]]
    b_ref:    (1, Cp)              f32 bias
    o_ref:    (1, TH, Wp, Cp)      f32 output strip
    """
    th = o_ref.shape[1]
    wp = o_ref.shape[2]
    cp = o_ref.shape[3]

    # (TH+2, Wp+2, Cp) padded strip: halo rows appended below the body rows.
    x = jnp.concatenate([body_ref[0], halo_ref[0]], axis=0)

    # Hoisted im2col: the three dx taps are concatenated along the lane
    # (channel) axis ONCE for all TH+2 rows; each dy only takes a cheap
    # leading-dim (sublane-aligned, Wp % 8 == 0) slice of it.
    patch_full = jnp.concatenate(
        [x[:, 0:wp, :], x[:, 1:wp + 1, :], x[:, 2:wp + 2, :]],
        axis=-1).reshape((th + 2) * wp, 3 * cp)          # bf16, K = 3*Cp

    bvec = b_ref[...]                                    # (1, Cp) f32, read once

    acc = None
    for dy in range(3):                                  # 3 bf16 MXU matmuls
        p = patch_full[dy * wp:(dy + th) * wp]           # static slice
        contrib = jnp.dot(p, w_ref[dy],
                          preferred_element_type=jnp.float32)
        acc = contrib if acc is None else acc + contrib

    out = jnp.maximum(acc + bvec, 0.0)                   # f32 bias + ReLU
    o_ref[...] = out.reshape(1, th, wp, cp).astype(o_ref.dtype)


@functools.lru_cache(maxsize=1)
def _vmem_budget():
    """(strip_target_bytes, vmem_limit_bytes), generation-aware."""
    vmem_bytes = 64 * 1024 * 1024                        # conservative default
    try:
        vmem_bytes = int(pltpu.get_tpu_info().vmem_capacity_bytes)
    except Exception:
        pass                                             # keep conservative default
    if vmem_bytes >= 100 * 1024 * 1024:                  # v5e / v6e: 128 MiB VMEM
        return 6 * 1024 * 1024, 96 * 1024 * 1024
    return 3 * 1024 * 1024, 48 * 1024 * 1024             # v7x: 64 MiB VMEM


def _choose_strip_rows(N, H, wp, cp, strip_target_bytes):
    """Rows per strip.

    Targets `strip_target_bytes` of bf16 padded input per strip so that the
    double-buffered in/out blocks plus the ~5-6x in-kernel transients
    (concat x + 3*Cp patch + f32 acc) stay inside the generation-aware
    vmem_limit, while keeping strips big enough to amortize the ~0.35 us
    per-grid-step overhead."""
    row_bytes = (wp + 2) * cp * 2                        # bf16
    th = strip_target_bytes // max(row_bytes, 1)
    th = int(max(8, min(512, th)))
    th -= th % 8                                         # even + sublane friendly
    if th > H:                                           # small feature maps
        th = max(8, ((H + 7) // 8) * 8)
    # v7x megacore: try to give the "parallel" grid at least 2 steps.
    if N * ((H + th - 1) // th) < 2 and H > 8:
        th = max(8, (((H + 1) // 2 + 7) // 8) * 8)
    return th


@functools.partial(jax.jit, static_argnames=("th", "wp", "vmem_limit"))
def _conv3x3_relu_call(x_nchw, w_stack, b2d, *, th, wp, vmem_limit):
    N, C, H, W = x_nchw.shape
    cp = w_stack.shape[-1]
    half = th // 2
    n_strips = -(-H // th)
    h_grid = n_strips * th                               # output rows (>= H)
    wp2 = wp + 2

    # NCHW -> NHWC, cast to bf16 (MXU-native), single fused pad:
    # 1 top-halo row, (h_grid+1-H) bottom rows (halo + strip alignment only),
    # 1 left + (wp-W+1) right columns, channel pad up to Cp lanes.
    x_nhwc = jnp.transpose(x_nchw, (0, 2, 3, 1)).astype(jnp.bfloat16)
    x_pad = jnp.pad(
        x_nhwc, ((0, 0), (1, h_grid + 1 - H), (1, wp - W + 1), (0, cp - C)))

    flops = 2 * 9 * N * h_grid * wp * cp * cp
    bytes_accessed = int(
        N * n_strips * (th + 2) * wp2 * cp * 2           # bf16 input strips+halos
        + N * h_grid * wp * cp * 4                       # f32 output
        + 9 * cp * cp * 2 + cp * 4)                      # bf16 weights + f32 bias

    out_nhwc = pl.pallas_call(
        _conv3x3_relu_kernel,
        out_shape=jax.ShapeDtypeStruct((N, h_grid, wp, cp), jnp.float32),
        grid_spec=pltpu.PrefetchScalarGridSpec(
            num_scalar_prefetch=0,
            grid=(N, n_strips),
            in_specs=[
                # TH body rows of the strip.
                pl.BlockSpec((1, th, wp2, cp), lambda n, i: (n, i, 0, 0)),
                # 2-row bottom halo (block of height 2 starting at (i+1)*TH).
                pl.BlockSpec((1, 2, wp2, cp),
                             lambda n, i: (n, (i + 1) * half, 0, 0)),
                # Weights and bias: resident, constant across the grid.
                pl.BlockSpec((3, 3 * cp, cp), lambda n, i: (0, 0, 0)),
                pl.BlockSpec((1, cp), lambda n, i: (0, 0)),
            ],
            out_specs=pl.BlockSpec((1, th, wp, cp), lambda n, i: (n, i, 0, 0)),
        ),
        compiler_params=pltpu.CompilerParams(
            dimension_semantics=("parallel", "parallel"),
            vmem_limit_bytes=vmem_limit),
        cost_estimate=pl.CostEstimate(
            flops=flops, transcendentals=0, bytes_accessed=bytes_accessed),
    )(x_pad, x_pad, w_stack, b2d)

    # Crop alignment rows / width / channel pad, NHWC -> NCHW (module contract).
    return jnp.transpose(out_nhwc[:, :H, :W, :C], (0, 3, 1, 2))


def _conv3x3_relu_single(x_nchw, w_stack, b2d, strip_rows=None):
    """conv3x3(pad=1, stride=1) + ReLU via the Pallas kernel (NCHW in/out)."""
    N, C, H, W = x_nchw.shape
    cp = w_stack.shape[-1]
    assert w_stack.shape == (3, 3 * cp, cp)
    strip_target, vmem_limit = _vmem_budget()
    wp = ((W + 7) // 8) * 8                              # lane/sublane friendly W
    th = (strip_rows if strip_rows is not None
          else _choose_strip_rows(N, H, wp, cp, strip_target))
    assert th >= 2 and th % 2 == 0                       # halo block-index trick
    return _conv3x3_relu_call(x_nchw, w_stack, b2d,
                              th=th, wp=wp, vmem_limit=vmem_limit)


def _prepare_conv_weights(weight_oihw, bias):
    """(O,I,3,3) f32 -> bf16 (3, 3*Cp, Cp) stack + f32 (1, Cp) bias row."""
    C = weight_oihw.shape[0]
    cp = ((C + _LANE - 1) // _LANE) * _LANE
    w_hwio = jnp.transpose(weight_oihw, (2, 3, 1, 0)).astype(jnp.bfloat16)
    w_hwio = jnp.pad(w_hwio, ((0, 0), (0, 0), (0, cp - C), (0, cp - C)))
    w_stack = w_hwio.reshape(3, 3 * cp, cp)              # (dy, [dx;in_c], out_c)
    b2d = jnp.pad(bias.astype(jnp.float32), (0, cp - C)).reshape(1, cp)
    return w_stack, b2d


def _conv3x3_relu_xla(x_nchw, weight_oihw, bias, compute_dtype=jnp.float32):
    """Plain-XLA conv + ReLU (used for tiny-C dispatch and as reference)."""
    out = jax.lax.conv_general_dilated(
        x_nchw.astype(compute_dtype), weight_oihw.astype(compute_dtype),
        window_strides=(1, 1), padding=((1, 1), (1, 1)),
        dimension_numbers=("NCHW", "OIHW", "NCHW"),
        preferred_element_type=jnp.float32)
    out = out + bias.reshape(1, -1, 1, 1).astype(jnp.float32)
    return jnp.maximum(out, 0.0)


class RPNHeadFeatureSingleConvPallas:
    """JAX/Pallas port of RPNHeadFeatureSingleConv."""

    def __init__(self, in_channels, key, pallas_min_channels=65):
        # nn.Conv2d(in_channels, in_channels, 3, stride=1, padding=1)
        # weight ~ Normal(0, 0.01), bias = 0   (matches the PyTorch __init__)
        self.weight = 0.01 * jax.random.normal(
            key, (in_channels, in_channels, 3, 3), dtype=jnp.float32)
        self.bias = jnp.zeros((in_channels,), dtype=jnp.float32)
        self.out_channels = in_channels
        # Tiny-C levels pay (128/C)^2 padded MXU FLOPs; route them to XLA.
        self._use_pallas = in_channels >= pallas_min_channels
        # Precompute the padded bf16 weight stack / f32 bias once (not per level).
        self.w_stack, self.b2d = _prepare_conv_weights(self.weight, self.bias)

    def __call__(self, x):
        assert isinstance(x, (list, tuple))
        if self._use_pallas:
            return [_conv3x3_relu_single(z, self.w_stack, self.b2d) for z in x]
        return [_conv3x3_relu_xla(z, self.weight, self.bias) for z in x]


if __name__ == "__main__":
    key = jax.random.PRNGKey(0)
    k_w, k_w2, k_x0, k_x1, k_x2 = jax.random.split(key, 5)

    # ---- Small-C module (C=4): __call__ routes through plain XLA per the
    #      perf review; the Pallas kernel is exercised directly below.
    in_channels = 4
    module = RPNHeadFeatureSingleConvPallas(in_channels, k_w)
    x0 = jax.random.normal(k_x0, (2, in_channels, 16, 16), dtype=jnp.float32)
    x1 = jax.random.normal(k_x1, (2, in_channels, 8, 8), dtype=jnp.float32)
    inputs = [x0, x1]

    outputs = [jax.block_until_ready(o) for o in module(inputs)]
    for x, o in zip(inputs, outputs):
        ref = _conv3x3_relu_xla(x, module.weight, module.bias)
        assert o.shape == x.shape
        assert jnp.allclose(o, ref, atol=1e-5, rtol=1e-5), "XLA path mismatch"

    # ---- Pallas kernel on the same C=4 inputs (forced), checked tightly
    #      against a bf16-input reference and loosely against the f32 one.
    for x in inputs:
        o = jax.block_until_ready(
            _conv3x3_relu_single(x, module.w_stack, module.b2d))
        ref_bf16 = _conv3x3_relu_xla(x, module.weight, module.bias, jnp.bfloat16)
        ref_f32 = _conv3x3_relu_xla(x, module.weight, module.bias)
        assert o.shape == x.shape
        assert jnp.allclose(o, ref_bf16, atol=1e-4, rtol=1e-4), \
            "Pallas kernel mismatch vs bf16 reference"
        assert jnp.allclose(o, ref_f32, atol=5e-2, rtol=0.0), \
            "Pallas kernel mismatch vs f32 reference (loose)"

    # ---- Multi-strip (halo stitching) path explicitly.
    o_strips = jax.block_until_ready(
        _conv3x3_relu_single(x0, module.w_stack, module.b2d, strip_rows=8))
    ref0 = _conv3x3_relu_xla(x0, module.weight, module.bias, jnp.bfloat16)
    assert jnp.allclose(o_strips, ref0, atol=1e-4, rtol=1e-4), \
        "multi-strip path mismatch vs reference"

    # ---- Lane-dense C=128 module: __call__ routes through the Pallas kernel;
    #      odd H / non-multiple-of-8 W exercises the alignment padding.
    module128 = RPNHeadFeatureSingleConvPallas(128, k_w2)
    x2 = jax.random.normal(k_x2, (1, 128, 13, 14), dtype=jnp.float32)
    (o2,) = module128([x2])
    o2 = jax.block_until_ready(o2)
    ref2_bf16 = _conv3x3_relu_xla(x2, module128.weight, module128.bias, jnp.bfloat16)
    ref2_f32 = _conv3x3_relu_xla(x2, module128.weight, module128.bias)
    assert o2.shape == x2.shape
    assert jnp.allclose(o2, ref2_bf16, atol=5e-4, rtol=5e-4), \
        "C=128 Pallas path mismatch vs bf16 reference"
    assert jnp.allclose(o2, ref2_f32, atol=5e-2, rtol=0.0), \
        "C=128 Pallas path mismatch vs f32 reference (loose)"

    print("KERNEL_OK")
</pallas_src>

<mosaic_0001>
module attributes {stable_mosaic.version = 11 : i64} {
  func.func @_conv3x3_relu_kernel(%arg0: i32, %arg1: i32, %arg2: memref<1x16x18x128xbf16, #tpu.memory_space<vmem>>, %arg3: memref<1x2x18x128xbf16, #tpu.memory_space<vmem>>, %arg4: memref<3x384x128xbf16, #tpu.memory_space<vmem>>, %arg5: memref<1x128xf32, #tpu.memory_space<vmem>>, %arg6: memref<1x16x16x128xf32, #tpu.memory_space<vmem>>) attributes {dimension_semantics = [#tpu.dimension_semantics<parallel>, #tpu.dimension_semantics<parallel>], iteration_bounds = array<i64: 2, 1>, scalar_prefetch = 0 : i64, scratch_operands = 0 : i64, tpu.core_type = #tpu.core_type<tc>, window_params = [{transform_indices = @transform_0, window_bounds = array<i64: 1, 16, 18, 128>}, {transform_indices = @transform_1, window_bounds = array<i64: 1, 2, 18, 128>}, {pipeline_mode = #tpu.pipeline_mode<synchronous>, transform_indices = @transform_2, window_bounds = array<i64: 3, 384, 128>}, {pipeline_mode = #tpu.pipeline_mode<synchronous>, transform_indices = @transform_3, window_bounds = array<i64: 1, 128>}, {transform_indices = @transform_4, window_bounds = array<i64: 1, 16, 16, 128>}]} {
    %c0 = arith.constant 0 : index
    %c0_0 = arith.constant 0 : index
    %c0_1 = arith.constant 0 : index
    %c0_2 = arith.constant 0 : index
    %0 = vector.load %arg2[%c0, %c0_0, %c0_1, %c0_2] : memref<1x16x18x128xbf16, #tpu.memory_space<vmem>>, vector<1x16x18x128xbf16>
    %1 = vector.shape_cast %0 : vector<1x16x18x128xbf16> to vector<16x18x128xbf16>
    %c0_3 = arith.constant 0 : index
    %c0_4 = arith.constant 0 : index
    %c0_5 = arith.constant 0 : index
    %c0_6 = arith.constant 0 : index
    %2 = vector.load %arg3[%c0_3, %c0_4, %c0_5, %c0_6] : memref<1x2x18x128xbf16, #tpu.memory_space<vmem>>, vector<1x2x18x128xbf16>
    %3 = vector.shape_cast %2 : vector<1x2x18x128xbf16> to vector<2x18x128xbf16>
    %4 = tpu.concatenate %1, %3 in 0 : vector<16x18x128xbf16>, vector<2x18x128xbf16> -> vector<18x18x128xbf16>
    %5 = vector.extract_strided_slice %4 {offsets = [0, 0, 0], sizes = [18, 16, 128], strides = [1, 1, 1]} : vector<18x18x128xbf16> to vector<18x16x128xbf16>
    %6 = vector.extract_strided_slice %4 {offsets = [0, 1, 0], sizes = [18, 16, 128], strides = [1, 1, 1]} : vector<18x18x128xbf16> to vector<18x16x128xbf16>
    %7 = vector.extract_strided_slice %4 {offsets = [0, 2, 0], sizes = [18, 16, 128], strides = [1, 1, 1]} : vector<18x18x128xbf16> to vector<18x16x128xbf16>
    %8 = tpu.concatenate %5, %6, %7 in 2 : vector<18x16x128xbf16>, vector<18x16x128xbf16>, vector<18x16x128xbf16> -> vector<18x16x384xbf16>
    %9 = vector.shape_cast %8 : vector<18x16x384xbf16> to vector<288x384xbf16>
    %c0_7 = arith.constant 0 : index
    %c0_8 = arith.constant 0 : index
    %10 = vector.load %arg5[%c0_7, %c0_8] : memref<1x128xf32, #tpu.memory_space<vmem>>, vector<1x128xf32>
    %11 = vector.extract_strided_slice %9 {offsets = [0, 0], sizes = [256, 384], strides = [1, 1]} : vector<288x384xbf16> to vector<256x384xbf16>
    %c0_9 = arith.constant 0 : index
    %c0_10 = arith.constant 0 : index
    %c0_11 = arith.constant 0 : index
    %12 = vector.load %arg4[%c0_9, %c0_10, %c0_11] : memref<3x384x128xbf16, #tpu.memory_space<vmem>>, vector<1x384x128xbf16>
    %13 = vector.shape_cast %12 : vector<1x384x128xbf16> to vector<384x128xbf16>
    %cst = arith.constant dense<0.000000e+00> : vector<256x128xf32>
    %14 = tpu.matmul %11, %13, %cst {dimension_numbers = #tpu.dot_dimension_numbers<[1], [0], [0], [1], [0, 0, 1, 1], [], []>} : vector<256x384xbf16>, vector<384x128xbf16>, vector<256x128xf32> -> vector<256x128xf32>
    %15 = vector.extract_strided_slice %9 {offsets = [16, 0], sizes = [256, 384], strides = [1, 1]} : vector<288x384xbf16> to vector<256x384xbf16>
    %c1 = arith.constant 1 : index
    %c0_12 = arith.constant 0 : index
    %c0_13 = arith.constant 0 : index
    %16 = vector.load %arg4[%c1, %c0_12, %c0_13] : memref<3x384x128xbf16, #tpu.memory_space<vmem>>, vector<1x384x128xbf16>
    %17 = vector.shape_cast %16 : vector<1x384x128xbf16> to vector<384x128xbf16>
    %cst_14 = arith.constant dense<0.000000e+00> : vector<256x128xf32>
    %18 = tpu.matmul %15, %17, %cst_14 {dimension_numbers = #tpu.dot_dimension_numbers<[1], [0], [0], [1], [0, 0, 1, 1], [], []>} : vector<256x384xbf16>, vector<384x128xbf16>, vector<256x128xf32> -> vector<256x128xf32>
    %19 = arith.addf %14, %18 : vector<256x128xf32>
    %20 = vector.extract_strided_slice %9 {offsets = [32, 0], sizes = [256, 384], strides = [1, 1]} : vector<288x384xbf16> to vector<256x384xbf16>
    %c2 = arith.constant 2 : index
    %c0_15 = arith.constant 0 : index
    %c0_16 = arith.constant 0 : index
    %21 = vector.load %arg4[%c2, %c0_15, %c0_16] : memref<3x384x128xbf16, #tpu.memory_space<vmem>>, vector<1x384x128xbf16>
    %22 = vector.shape_cast %21 : vector<1x384x128xbf16> to vector<384x128xbf16>
    %cst_17 = arith.constant dense<0.000000e+00> : vector<256x128xf32>
    %23 = tpu.matmul %20, %22, %cst_17 {dimension_numbers = #tpu.dot_dimension_numbers<[1], [0], [0], [1], [0, 0, 1, 1], [], []>} : vector<256x384xbf16>, vector<384x128xbf16>, vector<256x128xf32> -> vector<256x128xf32>
    %24 = arith.addf %19, %23 : vector<256x128xf32>
    %25 = vector.broadcast %10 : vector<1x128xf32> to vector<256x128xf32>
    %26 = arith.addf %24, %25 : vector<256x128xf32>
    %cst_18 = arith.constant 0.000000e+00 : f32
    %27 = vector.broadcast %cst_18 : f32 to vector<256x128xf32>
    %28 = arith.maximumf %26, %27 : vector<256x128xf32>
    %29 = vector.shape_cast %28 : vector<256x128xf32> to vector<1x16x16x128xf32>
    %c0_19 = arith.constant 0 : index
    %c0_20 = arith.constant 0 : index
    %c0_21 = arith.constant 0 : index
    %c0_22 = arith.constant 0 : index
    %30 = vector.load %arg6[%c0_19, %c0_20, %c0_21, %c0_22] : memref<1x16x16x128xf32, #tpu.memory_space<vmem>>, vector<1x16x16x128xf32>
    tpu.vector_store %arg6[%c0_19, %c0_20, %c0_21, %c0_22], %29 {strides = array<i32>} : memref<1x16x16x128xf32, #tpu.memory_space<vmem>>, vector<1x16x16x128xf32>,
    return
  }
  func.func @transform_0(%arg0: i32, %arg1: i32) -> (i32, i32, i32, i32) {
    %c0_i32 = arith.constant 0 : i32
    %c0_i32_0 = arith.constant 0 : i32
    %c0_i32_1 = arith.constant 0 : i32
    return %arg0, %arg1, %c0_i32, %c0_i32_0 : i32, i32, i32, i32
  }
  func.func @transform_1(%arg0: i32, %arg1: i32) -> (i32, i32, i32, i32) {
    %c1_i32 = arith.constant 1 : i32
    %0 = arith.addi %arg1, %c1_i32 : i32
    %c8_i32 = arith.constant 8 : i32
    %1 = arith.muli %0, %c8_i32 : i32
    %c0_i32 = arith.constant 0 : i32
    %c0_i32_0 = arith.constant 0 : i32
    %c0_i32_1 = arith.constant 0 : i32
    return %arg0, %1, %c0_i32, %c0_i32_0 : i32, i32, i32, i32
  }
  func.func @transform_2(%arg0: i32, %arg1: i32) -> (i32, i32, i32) {
    %c0_i32 = arith.constant 0 : i32
    %c0_i32_0 = arith.constant 0 : i32
    %c0_i32_1 = arith.constant 0 : i32
    %c0_i32_2 = arith.constant 0 : i32
    return %c0_i32, %c0_i32_0, %c0_i32_1 : i32, i32, i32
  }
  func.func @transform_3(%arg0: i32, %arg1: i32) -> (i32, i32) {
    %c0_i32 = arith.constant 0 : i32
    %c0_i32_0 = arith.constant 0 : i32
    %c0_i32_1 = arith.constant 0 : i32
    return %c0_i32, %c0_i32_0 : i32, i32
  }
  func.func @transform_4(%arg0: i32, %arg1: i32) -> (i32, i32, i32, i32) {
    %c0_i32 = arith.constant 0 : i32
    %c0_i32_0 = arith.constant 0 : i32
    %c0_i32_1 = arith.constant 0 : i32
    return %arg0, %arg1, %c0_i32, %c0_i32_0 : i32, i32, i32, i32
  }
}

</mosaic_0001>

<bundles_post_ra>
// kernel: _conv3x3_relu_call.1
= control target key start
LH: loop header
LB: loop body
LE: loop exit
PB: predicated region body
PF: predicated region fallthrough
CT: control target
= control target key end

     0   :  { %s3148_s15 = smov 0   ;;  %s3150_s16 = smov 0   ;;  %s4041_s0 = inlined_call_operand.vmem [shape: bf16[2,18,18,128], index: 0, kind: input, shape index: {}, may-alias: {0,1}]   ;;  %s4042_s1 = inlined_call_operand.vmem [shape: bf16[2,18,18,128], index: 1, kind: input, shape index: {}, may-alias: {0,1}]   ;;  %s4043_s2 = inlined_call_operand.vmem [shape: bf16[3,384,128], index: 2, kind: input, shape index: {}]   ;;  %s4044_s3 = inlined_call_operand.vmem [shape: f32[1,128], index: 3, kind: input, shape index: {}]   ;;  %s4045_s4 = inlined_call_operand.vmem [shape: f32[2,16,16,128], index: 4, kind: output, shape index: {}]  }
   0x1   :  { %s3152_s17 = smov 0  }
   0x2 LB: > { %s26_s18 = sadd.s32 1, %s3117_s16  ;;  %p2476_p0 = scmp.ge.s32.totalorder %s3121_s17, 1  ;;  %s3121_s17 = sphi %s3152_s17, %s14_s17   ;;  %s3117_s16 = sphi %s3150_s16, %s4112_s16   ;;  %s3113_s15 = sphi %s3148_s15, %s4111_s15  }
   0x3   : > { %p28_p1 = scmp.ge.s32.totalorder %s26_s18, 2  ;;  %p220_p2 = scmp.lt.s32.totalorder %s3121_s17, 3 }
   0x5   : > { %s4114_s18 = smov (%p28_p1, %s26_s18), 0  ;;  %p221_p3 = pnand %p2476_p0, %p220_p2 }
   0x7   : > { %224 = sbr.rel (%p221_p3) target bundleno = 756 (0x2f4), region = 36 }
   0xc   : > { %v2991_v0 = vld [vmem:[%s4043_s2 + $0xf8] sm:$0xff]  ;;  %p279_p4 = scmp.lt.s32.totalorder %s3113_s15, 1  ;;  %v2990_v1 = vld [vmem:[%s4043_s2 + $0xf0] sm:$0xff]  ;;  %v2989_v2 = vld [vmem:[%s4043_s2 + $0xe8] sm:$0xff]  ;;  %vm536_vm0 = vsmask.f32 7424 }
   0xd   : > { %1086 = vmatpush.bf16.msra.mxu0 %v2991_v0  ;;  %3032 = vmatpush.bf16.msra.mxu1 %v2991_v0  ;;  %v2988_v3 = vld [vmem:[%s4043_s2 + $0xe0] sm:$0xff]  ;;  %v2987_v4 = vld [vmem:[%s4043_s2 + $0xd8] sm:$0xff]  ;;  %v2986_v5 = vld [vmem:[%s4043_s2 + $0xd0] sm:$0xff]  ;;  %vm771_vm1 = vcmask 1046528  }
   0xe   : > { %3033 = vmatpush.bf16.msra.mxu2 %v2991_v0  ;;  %3034 = vmatpush.bf16.msra.mxu3 %v2991_v0  ;;  %s4116_s15 = smov (!%p279_p4, %s3113_s15), 1  ;;  %v2985_v6 = vld [vmem:[%s4043_s2 + $0xc8] sm:$0xff]  ;;  %v2984_v7 = vld [vmem:[%s4043_s2 + $0xc0] sm:$0xff]  ;;  %v3007_v8 = vld [vmem:[%s4043_s2 + $0x178] sm:$0xff] }
   0xf   : > { %s3056_s7 = smul.u32 216, %s4116_s15  ;;  %v2967_v9 = vld [vmem:[%s4043_s2 + $0x38] sm:$0xff]  ;;  %v3006_v16 = vld [vmem:[%s4043_s2 + $0x170] sm:$0xff]  ;;  %v3005_v20 = vld [vmem:[%s4043_s2 + $0x168] sm:$0xff]  ;;  %s2941_s30 = sshll.u32 %s4116_s15, 8 }
  0x10   : > { %v2999_v14 = vld [vmem:[%s4043_s2 + $0x138] sm:$0xff]  ;;  %v2966_v17 = vld [vmem:[%s4043_s2 + $0x30] sm:$0xff]  ;;  %v2965_v21 = vld [vmem:[%s4043_s2 + $0x28] sm:$0xff]  ;;  %s3907_s8 = scalar_lea.vmem %s4045_s4, %s2941_s30 }
  0x11   : > { %1087 = vmatpush.bf16.msra.mxu0 %v2990_v1  ;;  %3035 = vmatpush.bf16.msra.mxu1 %v2990_v1  ;;  %s3198_s12 = scalar_lea.vmem %s4041_s0, %s3056_s7  ;;  %v2975_v15 = vld [vmem:[%s4043_s2 + $0x78] sm:$0xff]  ;;  %v2998_v18 = vld [vmem:[%s4043_s2 + $0x130] sm:$0xff]  ;;  %v2997_v22 = vld [vmem:[%s4043_s2 + $0x128] sm:$0xff]  ;;  %s2940_s29 = sadd.s32 192, %s3056_s7 }
  0x12   : > { %3036 = vmatpush.bf16.msra.mxu2 %v2990_v1  ;;  %3037 = vmatpush.bf16.msra.mxu3 %v2990_v1  ;;  %v3207_v10 = vld [vmem:[%s3198_s12 + $0xc] sm:$0xff]  ;;  %v3210_v11 = vld [vmem:[%s3198_s12 + $0x3c] sm:$0xff]  ;;  %v3329_v48 = vld [vmem:[%s3198_s12 + $0x24] sm:$0xff]  ;;  %s3361_s6 = scalar_lea.vmem %s4042_s1, %s2940_s29 }
  0x13   : > { %v3213_v12 = vld [vmem:[%s3198_s12 + $0x6c] sm:$0xff]  ;;  %v3216_v13 = vld [vmem:[%s3198_s12 + $0x9c] sm:$0xff]  ;;  %v3332_v49 = vld [vmem:[%s3198_s12 + $0x54] sm:$0xff]  ;;  %v552_v1 = vshll.u32 %v3207_v10, 16 }
  0x14   : > { %v2974_v19 = vld [vmem:[%s4043_s2 + $0x70] sm:$0xff]  ;;  %v2973_v23 = vld [vmem:[%s4043_s2 + $0x68] sm:$0xff]  ;;  %v3004_v24 = vld [vmem:[%s4043_s2 + $0x160] sm:$0xff] }
  0x15   : > { %1088 = vmatpush.bf16.msra.mxu0 %v2989_v2  ;;  %3038 = vmatpush.bf16.msra.mxu1 %v2989_v2  ;;  %v2964_v25 = vld [vmem:[%s4043_s2 + $0x20] sm:$0xff]  ;;  %v3003_v28 = vld [vmem:[%s4043_s2 + $0x158] sm:$0xff]  ;;  %v3274_v31 = vld [vmem:[%s3198_s12 + $0x48] sm:$0xff] }
  0x16   : > { %3039 = vmatpush.bf16.msra.mxu2 %v2989_v2  ;;  %3040 = vmatpush.bf16.msra.mxu3 %v2989_v2  ;;  %v2996_v26 = vld [vmem:[%s4043_s2 + $0x120] sm:$0xff]  ;;  %v2963_v29 = vld [vmem:[%s4043_s2 + $0x18] sm:$0xff]  ;;  %v3280_v33 = vld [vmem:[%s3198_s12 + $0xa8] sm:$0xff] }
  0x17   : > { %v2972_v27 = vld [vmem:[%s4043_s2 + $0x60] sm:$0xff]  ;;  %v3271_v30 = vld [vmem:[%s3198_s12 + $0x18] sm:$0xff]  ;;  %v3002_v36 = vld [vmem:[%s4043_s2 + $0x150] sm:$0xff] }
  0x18   : > { %v3277_v32 = vld [vmem:[%s3198_s12 + $0x78] sm:$0xff]  ;;  %v2962_v37 = vld [vmem:[%s4043_s2 + $0x10] sm:$0xff]  ;;  %v3001_v40 = vld [vmem:[%s4043_s2 + $0x148] sm:$0xff] }
  0x19   : > { %1089 = vmatpush.bf16.msra.mxu0 %v2988_v3  ;;  %3041 = vmatpush.bf16.msra.mxu1 %v2988_v3  ;;  %v2995_v34 = vld [vmem:[%s4043_s2 + $0x118] sm:$0xff]  ;;  %v2994_v38 = vld [vmem:[%s4043_s2 + $0x110] sm:$0xff]  ;;  %v2961_v41 = vld [vmem:[%s4043_s2 + $0x8] sm:$0xff] }
  0x1a   : > { %3042 = vmatpush.bf16.msra.mxu2 %v2988_v3  ;;  %3043 = vmatpush.bf16.msra.mxu3 %v2988_v3  ;;  %v2971_v35 = vld [vmem:[%s4043_s2 + $0x58] sm:$0xff]  ;;  %v2970_v39 = vld [vmem:[%s4043_s2 + $0x50] sm:$0xff]  ;;  %v2993_v42 = vld [vmem:[%s4043_s2 + $0x108] sm:$0xff] }
  0x1b   : > { %v2969_v43 = vld [vmem:[%s4043_s2 + $0x48] sm:$0xff]  ;;  %v3000_v44 = vld [vmem:[%s4043_s2 + $0x140] sm:$0xff]  ;;  %v3338_v51 = vld [vmem:[%s3198_s12 + $0xb4] sm:$0xff] }
  0x1c   : > { %v2960_v45 = vld [vmem:[%s4043_s2] sm:$0xff]  ;;  %v3015_v52 = vld [vmem:[%s4043_s2 + $0x1b8] sm:$0xff]  ;;  %v325_v56 = vld [vmem:[%s3198_s12 + $0x14] sm:$0x1] }
  0x1d   : > { %1090 = vmatpush.bf16.msra.mxu0 %v2987_v4  ;;  %3044 = vmatpush.bf16.msra.mxu1 %v2987_v4  ;;  %v2992_v46 = vld [vmem:[%s4043_s2 + $0x100] sm:$0xff]  ;;  %v3023_v53 = vld [vmem:[%s4043_s2 + $0x1f8] sm:$0xff]  ;;  %v322_v57 = vld [vmem:[%s3198_s12 + $0x8] sm:$0x1]  ;;  %v501_v62 = vunpack.c.l.b16 %v325_v56 }
  0x1e   : > { %3045 = vmatpush.bf16.msra.mxu2 %v2987_v4  ;;  %3046 = vmatpush.bf16.msra.mxu3 %v2987_v4  ;;  %v2968_v47 = vld [vmem:[%s4043_s2 + $0x40] sm:$0xff]  ;;  %v2983_v54 = vld [vmem:[%s4043_s2 + $0xb8] sm:$0xff]  ;;  %v3366_v58 = vld [vmem:[%s3198_s12 + $0x30] sm:$0xff]  ;;  %v500_v0 = vunpack.c.l.b16 %v322_v57 }
  0x1f   : > { %v3335_v50 = vld [vmem:[%s3198_s12 + $0x84] sm:$0xff]  ;;  %v3031_v55 = vld [vmem:[%s4043_s2 + $0x238] sm:$0xff]  ;;  %v3372_v60 = vld [vmem:[%s3198_s12 + $0x90] sm:$0xff]  ;;  %v519_v2 = vpack.c.b16 %v501_v62, %v501_v62  ;;  %v781_v62 = vrot.slane %v3329_v48, 1 }
  0x20   : > { %v3369_v59 = vld [vmem:[%s3198_s12 + $0x60] sm:$0xff]  ;;  %v3385_v3 = vpack.c.b16 %v500_v0, %v500_v0 }
  0x21   : > { %1091 = vmatpush.bf16.msra.mxu0 %v2986_v5  ;;  %3047 = vmatpush.bf16.msra.mxu1 %v2986_v5  ;;  %v3375_v61 = vld [vmem:[%s3361_s6] sm:$0xff] }
  0x22   : > { %3048 = vmatpush.bf16.msra.mxu2 %v2986_v5  ;;  %3049 = vmatpush.bf16.msra.mxu3 %v2986_v5  ;;  %v3378_v63 = vld [vmem:[%s3198_s12] sm:$0xff]  ;;  %v550_v5 = vshrl.u32 %v3207_v10, 16 }
  0x23   : > { %v540_v4 = vshll.u32 %v3378_v63, 16 }
  0x25   : > { %1092 = vmatpush.bf16.msra.mxu0 %v2985_v6  ;;  %3050 = vmatpush.bf16.msra.mxu1 %v2985_v6 }
  0x26   : > { %3051 = vmatpush.bf16.msra.mxu2 %v2985_v6  ;;  %3052 = vmatpush.bf16.msra.mxu3 %v2985_v6  ;;  %v554_v6 = vrot.slane %v552_v1, 1  ;;  %v334_v1 = vld [vmem:[%s3198_s12 + $0x38] sm:$0x1] }
  0x29   : > { %1093 = vmatpush.bf16.msra.mxu0 %v2984_v7  ;;  %3053 = vmatpush.bf16.msra.mxu1 %v2984_v7 }
  0x2a   : > { %3054 = vmatpush.bf16.msra.mxu2 %v2984_v7  ;;  %3055 = vmatpush.bf16.msra.mxu3 %v2984_v7  ;;  %v557_v7 = vshll.u32 %v519_v2, 16 }
  0x2c   : > { %1094 = vmatmul.bf16.vlgmr.msra.gmra.mxu0 %v3207_v10  ;;  %1114 = vmatmul.bf16.vlgmr.msra.gmra.mxu1 %v3210_v11 }
  0x2d   : > { %1134 = vmatmul.bf16.vlgmr.msra.gmra.mxu2 %v3213_v12  ;;  %1154 = vmatmul.bf16.vlgmr.msra.gmra.mxu3 %v3216_v13 }
  0x2e   : > { %1264 = vmatpush.bf16.msrb.mxu2 %v3007_v8  ;;  %1497 = vmatpush.bf16.msrb.mxu3 %v2967_v9  ;;  %v538_v8 = vshrl.u32 %v3378_v63, 16  ;;  %v542_v9 = vrot.slane %v540_v4, 1  ;;  %v504_v4 = vunpack.c.l.b16 %v334_v1  ;;  %v2980_v1 = vld [vmem:[%s4043_s2 + $0xa0] sm:$0xff] }
  0x2f   : > { %1175 = vmatpush.bf16.msrb.mxu1 %v2999_v14  ;;  %1586 = vmatpush.bf16.msrb.mxu0 %v2975_v15  ;;  %v545_v14 = vshll.u32 %v3385_v3, 16  ;;  %v555_v15 = vor.u32 %v554_v6, %v550_v5  ;;  %v588_v6 = vshll.u32 %v3366_v58, 16 }
  0x32   : > { %1265 = vmatpush.bf16.msrb.mxu2 %v3006_v16  ;;  %1498 = vmatpush.bf16.msrb.mxu3 %v2966_v17  ;;  %v559_v16 = vrot.slane %v557_v7, 1  ;;  %v543_v17 = vor.u32 %v542_v9, %v538_v8  ;;  %v3013_v7 = vld [vmem:[%s4043_s2 + $0x1a8] sm:$0xff]  ;;  %v586_v9 = vshrl.u32 %v3366_v58, 16 }
  0x33   : > { %1176 = vmatpush.bf16.msrb.mxu1 %v2998_v18  ;;  %1587 = vmatpush.bf16.msrb.mxu0 %v2974_v19  ;;  %v547_v18 = vrot.slane %v545_v14, 1  ;;  %v775_v19 = vrot.slane %v3207_v10, 1  ;;  %v3021_v8 = vld [vmem:[%s4043_s2 + $0x1e8] sm:$0xff]  ;;  %v590_v14 = vrot.slane %v588_v6, 1 }
  0x36   : > { %1266 = vmatpush.bf16.msrb.mxu2 %v3005_v20  ;;  %1499 = vmatpush.bf16.msrb.mxu3 %v2965_v21  ;;  %v776_v20 = vrot.slane %v519_v2, 1  ;;  %v328_v21 = vld [vmem:[%s3198_s12 + $0x20] sm:$0x1] }
  0x37   : > { %1177 = vmatpush.bf16.msrb.mxu1 %v2997_v22  ;;  %1588 = vmatpush.bf16.msrb.mxu0 %v2973_v23  ;;  %v560_v22 = vsel %vm536_vm0, %v555_v15, %v559_v16  ;;  %v548_v23 = vsel %vm536_vm0, %v543_v17, %v547_v18  ;;  %v3029_v16 = vld [vmem:[%s4043_s2 + $0x228] sm:$0xff]  ;;  %v591_v17 = vor.u32 %v590_v14, %v586_v9  ;;  %v343_v9 = vld [vmem:[%s3198_s12 + $0x5c] sm:$0x1] }
  0x3a   : > { %1267 = vmatpush.bf16.msrb.mxu2 %v3004_v24  ;;  %1500 = vmatpush.bf16.msrb.mxu3 %v2964_v25  ;;  %v502_v24 = vunpack.c.l.b16 %v328_v21  ;;  %v3396_v25 = vsel %vm771_vm1, %v775_v19, %v776_v20  ;;  %v784_v19 = vrot.slane %v3366_v58, 1  ;;  %v337_v21 = vld [vmem:[%s3198_s12 + $0x44] sm:$0x1] }
  0x3b   : > { %1178 = vmatpush.bf16.msrb.mxu1 %v2996_v26  ;;  %1589 = vmatpush.bf16.msrb.mxu0 %v2972_v27  ;;  %v564_v27 = vshll.u32 %v3271_v30, 16 }
  0x3c   : > { %1099 = vmatmul.bf16.gmra.mxu0 %v3271_v30  ;;  %1119 = vmatmul.bf16.gmra.mxu1 %v3274_v31  ;;  %v520_v26 = vpack.c.b16 %v502_v24, %v502_v24 }
  0x3d   : > { %1139 = vmatmul.bf16.gmra.mxu2 %v3277_v32  ;;  %1159 = vmatmul.bf16.gmra.mxu3 %v3280_v33 }
  0x3e   : > { %1268 = vmatpush.bf16.msrb.mxu2 %v3003_v28  ;;  %1501 = vmatpush.bf16.msrb.mxu3 %v2963_v29  ;;  %v3014_v28 = vld [vmem:[%s4043_s2 + $0x1b0] sm:$0xff] }
  0x3f   : > { %1179 = vmatpush.bf16.msrb.mxu1 %v2995_v34  ;;  %1590 = vmatpush.bf16.msrb.mxu0 %v2971_v35  ;;  %v3022_v29 = vld [vmem:[%s4043_s2 + $0x1f0] sm:$0xff] }
  0x40   : > { %v2982_v34 = vld [vmem:[%s4043_s2 + $0xb0] sm:$0xff] }
  0x41   : > { %v3030_v35 = vld [vmem:[%s4043_s2 + $0x230] sm:$0xff] }
  0x42   : > { %1269 = vmatpush.bf16.msrb.mxu2 %v3002_v36  ;;  %1502 = vmatpush.bf16.msrb.mxu3 %v2962_v37  ;;  %v562_v36 = vshrl.u32 %v3271_v30, 16  ;;  %v566_v37 = vrot.slane %v564_v27, 1  ;;  %v600_v27 = vshll.u32 %v3210_v11, 16 }
  0x43   : > { %1180 = vmatpush.bf16.msrb.mxu1 %v2994_v38  ;;  %1591 = vmatpush.bf16.msrb.mxu0 %v2970_v39  ;;  %v569_v38 = vshll.u32 %v520_v26, 16 }
  0x44   : > { %v567_v39 = vor.u32 %v566_v37, %v562_v36  ;;  %v787_v37 = vrot.slane %v3210_v11, 1 }
  0x46   : > { %1270 = vmatpush.bf16.msrb.mxu2 %v3001_v40  ;;  %1503 = vmatpush.bf16.msrb.mxu3 %v2961_v41  ;;  %v571_v40 = vrot.slane %v569_v38, 1  ;;  %v778_v41 = vrot.slane %v3271_v30, 1 }
  0x47   : > { %1181 = vmatpush.bf16.msrb.mxu1 %v2993_v42  ;;  %1592 = vmatpush.bf16.msrb.mxu0 %v2969_v43  ;;  %v779_v42 = vrot.slane %v520_v26, 1  ;;  %v331_v43 = vld [vmem:[%s3198_s12 + $0x2c] sm:$0x1] }
  0x4a   : > { %1271 = vmatpush.bf16.msrb.mxu2 %v3000_v44  ;;  %1504 = vmatpush.bf16.msrb.mxu3 %v2960_v45  ;;  %v3417_v44 = vsel %vm536_vm0, %v567_v39, %v571_v40  ;;  %v503_v45 = vunpack.c.l.b16 %v331_v43  ;;  %v340_v39 = vld [vmem:[%s3198_s12 + $0x50] sm:$0x1] }
  0x4b   : > { %1182 = vmatpush.bf16.msrb.mxu1 %v2992_v46  ;;  %1593 = vmatpush.bf16.msrb.mxu0 %v2968_v47  ;;  %v3420_v46 = vsel %vm771_vm1, %v778_v41, %v779_v42 }
  0x4c   : > { %1104 = vmatmul.bf16.gmra.mxu0 %v3329_v48  ;;  %1124 = vmatmul.bf16.gmra.mxu1 %v3332_v49  ;;  %v521_v47 = vpack.c.b16 %v503_v45, %v503_v45 }
  0x4d   : > { %1144 = vmatmul.bf16.gmra.mxu2 %v3335_v50  ;;  %1164 = vmatmul.bf16.gmra.mxu3 %v3338_v51 }
  0x4e   : > { %1957 = vmatpush.bf16.msra.mxu2 %v3015_v52  ;;  %2046 = vmatpush.bf16.msra.mxu3 %v3023_v53  ;;  %v576_v52 = vshll.u32 %v3329_v48, 16  ;;  %v574_v53 = vshrl.u32 %v3329_v48, 16  ;;  %v782_v0 = vrot.slane %v521_v47, 1 }
  0x4f   : > { %1675 = vmatpush.bf16.msra.mxu1 %v2983_v54  ;;  %2135 = vmatpush.bf16.msra.mxu0 %v3031_v55  ;;  %v581_v55 = vshll.u32 %v521_v47, 16  ;;  %v612_v47 = vshll.u32 %v3274_v31, 16 }
  0x50   : > { %v578_v54 = vrot.slane %v576_v52, 1  ;;  %v3433_v5 = vsel %vm771_vm1, %v781_v62, %v782_v0  ;;  %v3012_v52 = vld [vmem:[%s4043_s2 + $0x1a0] sm:$0xff] }
  0x51   : > { %v583_v57 = vrot.slane %v581_v55, 1  ;;  %v614_v62 = vrot.slane %v612_v47, 1 }
  0x52   : > { %1958 = vmatpush.bf16.msra.mxu2 %v3014_v28  ;;  %2047 = vmatpush.bf16.msra.mxu3 %v3022_v29  ;;  %v579_v56 = vor.u32 %v578_v54, %v574_v53  ;;  %v598_v28 = vshrl.u32 %v3210_v11, 16  ;;  %v602_v29 = vrot.slane %v600_v27, 1  ;;  %v3020_v53 = vld [vmem:[%s4043_s2 + $0x1e0] sm:$0xff] }
  0x53   : > { %1676 = vmatpush.bf16.msra.mxu1 %v2982_v34  ;;  %2136 = vmatpush.bf16.msra.mxu0 %v3030_v35 }
  0x54   : > { %v3430_v2 = vsel %vm536_vm0, %v579_v56, %v583_v57  ;;  %v603_v35 = vor.u32 %v602_v29, %v598_v28  ;;  %v610_v57 = vshrl.u32 %v3274_v31, 16  ;;  %v622_v29 = vshrl.u32 %v3332_v49, 16 }
  0x56   : > { %1959 = vmatpush.bf16.msra.mxu2 %v3013_v7  ;;  %2048 = vmatpush.bf16.msra.mxu3 %v3021_v8  ;;  %v790_v7 = vrot.slane %v3274_v31, 1 }
  0x57   : > { %2137 = vmatpush.bf16.msra.mxu0 %v3029_v16 }
  0x5a   : > { %1960 = vmatpush.bf16.msra.mxu2 %v3012_v52  ;;  %2049 = vmatpush.bf16.msra.mxu3 %v3020_v53 }
  0x5c   : > { %1109 = vmatmul.bf16.gmra.mxu0 %v3366_v58  ;;  %1129 = vmatmul.bf16.gmra.mxu1 %v3369_v59 }
  0x5d   : > { %1149 = vmatmul.bf16.gmra.mxu2 %v3372_v60  ;;  %1169 = vmatmul.bf16.gmra.mxu3 %v3375_v61 }
  0x6c   : > { %1183 = vmatmul.bf16.vlgmr.msrb.gmra.mxu1 %v560_v22  ;;  %1594 = vmatmul.bf16.vlgmr.msrb.gmra.mxu0 %v548_v23  ;;  %v505_v23 = vunpack.c.l.b16 %v337_v21  ;;  %v624_v21 = vshll.u32 %v3332_v49, 16 }
  0x6d   : > { %1272 = vmatmul.bf16.vlgmr.msrb.gmra.mxu2 %v3396_v25  ;;  %1505 = vmatmul.bf16.vlgmr.msrb.gmra.mxu3 %v3378_v63 }
  0x6e   : > { %v523_v26 = vpack.c.b16 %v505_v23, %v505_v23 }
  0x70   : > { %v605_v34 = vshll.u32 %v523_v26, 16  ;;  %v788_v38 = vrot.slane %v523_v26, 1 }
  0x72   : > { %v607_v36 = vrot.slane %v605_v34, 1  ;;  %v3477_v43 = vsel %vm771_vm1, %v787_v37, %v788_v38  ;;  %v626_v34 = vrot.slane %v624_v21, 1  ;;  %v793_v38 = vrot.slane %v3332_v49, 1  ;;  %v2979_v21 = vld [vmem:[%s4043_s2 + $0x98] sm:$0xff] }
  0x74   : > { %v3474_v42 = vsel %vm536_vm0, %v603_v35, %v607_v36  ;;  %v627_v36 = vor.u32 %v626_v34, %v622_v29  ;;  %v3027_v29 = vld [vmem:[%s4043_s2 + $0x218] sm:$0xff] }
  0x7c   : > { %1188 = vmatmul.bf16.gmra.mxu1 %v3417_v44  ;;  %1599 = vmatmul.bf16.gmra.mxu0 %v560_v22 }
  0x7d   : > { %1277 = vmatmul.bf16.gmra.mxu2 %v3420_v46  ;;  %1510 = vmatmul.bf16.gmra.mxu3 %v3207_v10  ;;  %v522_v10 = vpack.c.b16 %v504_v4, %v504_v4  ;;  %v3028_v4 = vld [vmem:[%s4043_s2 + $0x220] sm:$0xff] }
  0x7e   : > { %2138 = vmatpush.bf16.msra.mxu0 %v3028_v4  ;;  %v3011_v4 = vld [vmem:[%s4043_s2 + $0x198] sm:$0xff] }
  0x7f   : > { %v593_v15 = vshll.u32 %v522_v10, 16  ;;  %v785_v20 = vrot.slane %v522_v10, 1  ;;  %v615_v10 = vor.u32 %v614_v62, %v610_v57  ;;  %1961 = vmatpush.bf16.msra.mxu2 %v3011_v4 }
  0x81   : > { %v595_v18 = vrot.slane %v593_v15, 1  ;;  %v3459_v24 = vsel %vm771_vm1, %v784_v19, %v785_v20 }
  0x82   : > { %2139 = vmatpush.bf16.msra.mxu0 %v3027_v29 }
  0x83   : > { %v3456_v22 = vsel %vm536_vm0, %v591_v17, %v595_v18  ;;  %v507_v18 = vunpack.c.l.b16 %v343_v9  ;;  %v634_v9 = vshrl.u32 %v3369_v59, 16 }
  0x85   : > { %v525_v20 = vpack.c.b16 %v507_v18, %v507_v18 }
  0x87   : > { %v629_v35 = vshll.u32 %v525_v20, 16 }
  0x89   : > { %v631_v37 = vrot.slane %v629_v35, 1 }
  0x8b   : > { %v3546_v53 = vsel %vm536_vm0, %v627_v36, %v631_v37  ;;  %v796_v36 = vrot.slane %v3369_v59, 1 }
  0x8c   : > { %1193 = vmatmul.bf16.gmra.mxu1 %v3430_v2  ;;  %1604 = vmatmul.bf16.gmra.mxu0 %v3417_v44  ;;  %4067 = vst [vmem:[#allocation8_spill] sm:$0xff] %v3546_v53 }
  0x8d   : > { %1282 = vmatmul.bf16.gmra.mxu2 %v3433_v5  ;;  %1515 = vmatmul.bf16.gmra.mxu3 %v3271_v30  ;;  %v2981_v30 = vld [vmem:[%s4043_s2 + $0xa8] sm:$0xff] }
  0x8e   : > { %1677 = vmatpush.bf16.msra.mxu1 %v2981_v30 }
  0x92   : > { %1678 = vmatpush.bf16.msra.mxu1 %v2980_v1  ;;  %v636_v1 = vshll.u32 %v3369_v59, 16 }
  0x94   : > { %v638_v18 = vrot.slane %v636_v1, 1 }
  0x96   : > { %v639_v34 = vor.u32 %v638_v18, %v634_v9  ;;  %1679 = vmatpush.bf16.msra.mxu1 %v2979_v21  ;;  %v648_v18 = vshll.u32 %v3213_v12, 16 }
  0x9c   : > { %1198 = vmatmul.bf16.gmra.mxu1 %v3456_v22  ;;  %1609 = vmatmul.bf16.gmra.mxu0 %v3430_v2 }
  0x9d   : > { %1287 = vmatmul.bf16.gmra.mxu2 %v3459_v24  ;;  %1520 = vmatmul.bf16.gmra.mxu3 %v3329_v48  ;;  %v506_v48 = vunpack.c.l.b16 %v340_v39  ;;  %v346_v39 = vld [vmem:[%s3198_s12 + $0x68] sm:$0x1] }
  0x9e   : > { %v508_v57 = vunpack.c.l.b16 %v346_v39 }
  0x9f   : > { %v524_v45 = vpack.c.b16 %v506_v48, %v506_v48 }
  0xa1   : > { %v617_v0 = vshll.u32 %v524_v45, 16  ;;  %v791_v8 = vrot.slane %v524_v45, 1 }
  0xa3   : > { %v619_v6 = vrot.slane %v617_v0, 1  ;;  %v3519_v19 = vsel %vm771_vm1, %v790_v7, %v791_v8  ;;  %v526_v0 = vpack.c.b16 %v508_v57, %v508_v57 }
  0xa4   : > { %4064 = vst [vmem:[#allocation5_spill] sm:$0xff] %v3519_v19 }
  0xa5   : > { %v3516_v17 = vsel %vm536_vm0, %v615_v10, %v619_v6  ;;  %v3019_v10 = vld [vmem:[%s4043_s2 + $0x1d8] sm:$0xff]  ;;  %v797_v37 = vrot.slane %v526_v0, 1 }
  0xa6   : > { %4063 = vst [vmem:[#allocation4_spill] sm:$0xff] %v3516_v17  ;;  %2050 = vmatpush.bf16.msra.mxu3 %v3019_v10 }
  0xa7   : > { %v3591_v9 = vsel %vm771_vm1, %v796_v36, %v797_v37  ;;  %v650_v36 = vrot.slane %v648_v18, 1 }
  0xa8   : > { %4072 = vst [vmem:[#allocation13_spill] sm:$0xff] %v3591_v9 }
  0xa9   : > { %v3469_v40 = vpop.f32.mrf.mxu0  ;;  %v3471_v41 = vpop.f32.mrf.mxu1 }
  0xac   : > { %1203 = vmatmul.bf16.gmra.mxu1 %v3474_v42  ;;  %1614 = vmatmul.bf16.gmra.mxu0 %v3456_v22 }
  0xad   : > { %1292 = vmatmul.bf16.gmra.mxu2 %v3477_v43  ;;  %1525 = vmatmul.bf16.gmra.mxu3 %v3366_v58 }
  0xb0   : > { %v3490_v54 = vpop.f32.mrf.mxu2  ;;  %v3492_v55 = vpop.f32.mrf.mxu3 }
  0xb1   : > { %4061 = vst [vmem:[#allocation2_spill] sm:$0xff] %v3492_v55  ;;  %v3494_v56 = vpop.f32.mrf.mxu0  ;;  %v3496_v58 = vpop.f32.mrf.mxu1  ;;  %v355_v55 = vld [vmem:[%s3198_s12 + $0x8c] sm:$0x1] }
  0xb8   : > { %v3507_v14 = vpop.f32.mrf.mxu2  ;;  %v3509_v15 = vpop.f32.mrf.mxu3 }
  0xb9   : > { %4062 = vst [vmem:[#allocation3_spill] sm:$0xff] %v3509_v15  ;;  %v3511_v30 = vpop.f32.mrf.mxu0  ;;  %v3513_v16 = vpop.f32.mrf.mxu1 }
  0xbc   : > { %1208 = vmatmul.bf16.gmra.mxu1 %v3516_v17  ;;  %1619 = vmatmul.bf16.gmra.mxu0 %v3474_v42 }
  0xbd   : > { %1297 = vmatmul.bf16.gmra.mxu2 %v3519_v19  ;;  %1530 = vmatmul.bf16.gmra.mxu3 %v3210_v11  ;;  %v794_v11 = vrot.slane %v525_v20, 1  ;;  %v641_v20 = vshll.u32 %v526_v0, 16 }
  0xbf   : > { %v3549_v62 = vsel %vm771_vm1, %v793_v38, %v794_v11  ;;  %v643_v35 = vrot.slane %v641_v20, 1  ;;  %v349_v38 = vld [vmem:[%s3198_s12 + $0x74] sm:$0x1] }
  0xc0   : > { %v3526_v23 = vpop.f32.mrf.mxu2  ;;  %v3528_v26 = vpop.f32.mrf.mxu3  ;;  %4068 = vst [vmem:[#allocation9_spill] sm:$0xff] %v3549_v62  ;;  %v509_v10 = vunpack.c.l.b16 %v349_v38 }
  0xc1   : > { %4065 = vst [vmem:[#allocation6_spill] sm:$0xff] %v3528_v26  ;;  %v3530_v27 = vpop.f32.mrf.mxu0  ;;  %v3532_v28 = vpop.f32.mrf.mxu1  ;;  %v3588_v4 = vsel %vm536_vm0, %v639_v34, %v643_v35  ;;  %v646_v35 = vshrl.u32 %v3213_v12, 16 }
  0xc2   : > { %4071 = vst [vmem:[#allocation12_spill] sm:$0xff] %v3588_v4  ;;  %v527_v0 = vpack.c.b16 %v509_v10, %v509_v10  ;;  %v352_v10 = vld [vmem:[%s3198_s12 + $0x80] sm:$0x1] }
  0xc3   : > { %v651_v38 = vor.u32 %v650_v36, %v646_v35  ;;  %v660_v35 = vshll.u32 %v3277_v32, 16 }
  0xc4   : > { %v653_v37 = vshll.u32 %v527_v0, 16 }
  0xc8   : > { %v3537_v48 = vpop.f32.mrf.mxu2  ;;  %v3539_v45 = vpop.f32.mrf.mxu3 }
  0xc9   : > { %4066 = vst [vmem:[#allocation7_spill] sm:$0xff] %v3539_v45  ;;  %v3541_v47 = vpop.f32.mrf.mxu0  ;;  %v3543_v52 = vpop.f32.mrf.mxu1 }
  0xcc   : > { %1213 = vmatmul.bf16.gmra.mxu1 %v3546_v53  ;;  %1624 = vmatmul.bf16.gmra.mxu0 %v3516_v17 }
  0xcd   : > { %1302 = vmatmul.bf16.gmra.mxu2 %v3549_v62  ;;  %1535 = vmatmul.bf16.gmra.mxu3 %v3274_v31  ;;  %v510_v62 = vunpack.c.l.b16 %v352_v10 }
  0xd0   : > { %v3562_v6 = vpop.f32.mrf.mxu2  ;;  %v3564_v7 = vpop.f32.mrf.mxu3 }
  0xd1   : > { %4069 = vst [vmem:[#allocation10_spill] sm:$0xff] %v3564_v7  ;;  %v3566_v8 = vpop.f32.mrf.mxu0  ;;  %v3568_v31 = vpop.f32.mrf.mxu1  ;;  %v799_v7 = vrot.slane %v3213_v12, 1 }
  0xd8   : > { %v3579_v11 = vpop.f32.mrf.mxu2  ;;  %v3581_v39 = vpop.f32.mrf.mxu3 }
  0xd9   : > { %4070 = vst [vmem:[#allocation11_spill] sm:$0xff] %v3581_v39  ;;  %v3583_v57 = vpop.f32.mrf.mxu0  ;;  %v3585_v1 = vpop.f32.mrf.mxu1  ;;  %v655_v39 = vrot.slane %v653_v37, 1 }
  0xdc   : > { %1218 = vmatmul.bf16.gmra.mxu1 %v3588_v4  ;;  %1629 = vmatmul.bf16.gmra.mxu0 %v3546_v53  ;;  %v3614_v53 = vsel %vm536_vm0, %v651_v38, %v655_v39  ;;  %v3010_v39 = vld [vmem:[%s4043_s2 + $0x190] sm:$0xff] }
  0xdd   : > { %1307 = vmatmul.bf16.gmra.mxu2 %v3591_v9  ;;  %1540 = vmatmul.bf16.gmra.mxu3 %v3332_v49  ;;  %v800_v49 = vrot.slane %v527_v0, 1  ;;  %v528_v0 = vpack.c.b16 %v510_v62, %v510_v62  ;;  %v662_v62 = vrot.slane %v660_v35, 1  ;;  %v802_v35 = vrot.slane %v3277_v32, 1 }
  0xde   : > { %1962 = vmatpush.bf16.msra.mxu2 %v3010_v39  ;;  %v3026_v39 = vld [vmem:[%s4043_s2 + $0x210] sm:$0xff] }
  0xdf   : > { %v3618_v18 = vsel %vm771_vm1, %v799_v7, %v800_v49  ;;  %v665_v49 = vshll.u32 %v528_v0, 16  ;;  %2140 = vmatpush.bf16.msra.mxu0 %v3026_v39  ;;  %v670_v39 = vshrl.u32 %v3335_v50, 16 }
  0xe0   : > { %v3598_v20 = vpop.f32.mrf.mxu2  ;;  %v3600_v21 = vpop.f32.mrf.mxu3  ;;  %4076 = vst [vmem:[#allocation17_spill] sm:$0xff] %v3618_v18 }
  0xe1   : > { %4073 = vst [vmem:[#allocation14_spill] sm:$0xff] %v3600_v21  ;;  %v3602_v29 = vpop.f32.mrf.mxu0  ;;  %v3604_v34 = vpop.f32.mrf.mxu1 }
  0xe8   : > { %v3609_v9 = vpop.f32.mrf.mxu2  ;;  %v3611_v45 = vpop.f32.mrf.mxu3 }
  0xe9   : > { %4074 = vst [vmem:[#allocation15_spill] sm:$0xff] %v3609_v9  ;;  %v1184_v26 = vpop.f32.mrf.mxu1  ;;  %v1595_v21 = vpop.f32.mrf.mxu0  ;;  %v511_v9 = vunpack.c.l.b16 %v355_v55 }
  0xea   : > { %4075 = vst [vmem:[#allocation16_spill] sm:$0xff] %v3611_v45  ;;  %v1185_v15 = vadd.f32 %v1184_v26, %v3469_v40  ;;  %v3018_v40 = vld [vmem:[%s4043_s2 + $0x1d0] sm:$0xff] }
  0xeb   : > { %2051 = vmatpush.bf16.msra.mxu3 %v3018_v40 }
  0xec   : > { %1223 = vmatmul.bf16.gmra.mxu1 %v3614_v53  ;;  %1634 = vmatmul.bf16.gmra.mxu0 %v3588_v4  ;;  %v803_v4 = vrot.slane %v528_v0, 1  ;;  %v672_v0 = vshll.u32 %v3335_v50, 16 }
  0xed   : > { %1312 = vmatmul.bf16.gmra.mxu2 %v3618_v18  ;;  %1545 = vmatmul.bf16.gmra.mxu3 %v3369_v59  ;;  %v658_v59 = vshrl.u32 %v3277_v32, 16  ;;  %v2978_v18 = vld [vmem:[%s4043_s2 + $0x90] sm:$0xff] }
  0xee   : > { %1680 = vmatpush.bf16.msra.mxu1 %v2978_v18  ;;  %v3648_v18 = vsel %vm771_vm1, %v802_v35, %v803_v4 }
  0xef   : > { %v663_v40 = vor.u32 %v662_v62, %v658_v59  ;;  %4078 = vst [vmem:[#allocation19_spill] sm:$0xff] %v3648_v18 }
  0xf0   : > { %v1273_v26 = vpop.f32.mrf.mxu2  ;;  %v1506_v7 = vpop.f32.mrf.mxu3 }
  0xf1   : > { %v1274_v36 = vadd.f32 %v1273_v26, %v1185_v15  ;;  %v1186_v37 = vpop.f32.mrf.mxu1  ;;  %v1597_v38 = vpop.f32.mrf.mxu0  ;;  %v667_v15 = vrot.slane %v665_v49, 1 }
  0xf2   : > { %v1187_v10 = vadd.f32 %v1186_v37, %v3494_v56 }
  0xf3   : > { %v1507_v45 = vadd.f32 %v1506_v7, %v1274_v36  ;;  %v3644_v19 = vsel %vm536_vm0, %v663_v40, %v667_v15  ;;  %v674_v40 = vrot.slane %v672_v0, 1 }
  0xf5   : > { %v3639_v26 = vadd.f32 %v1595_v21, %v1507_v45  ;;  %v529_v21 = vpack.c.b16 %v511_v9, %v511_v9 }
  0xf7   : > { %4077 = vst [vmem:[#allocation18_spill] sm:$0xff] %v3639_v26  ;;  %v677_v15 = vshll.u32 %v529_v21, 16 }
  0xf8   : > { %v1275_v56 = vpop.f32.mrf.mxu2  ;;  %v1508_v7 = vpop.f32.mrf.mxu3 }
  0xf9   : > { %v1276_v36 = vadd.f32 %v1275_v56, %v1187_v10  ;;  %v1189_v37 = vpop.f32.mrf.mxu1  ;;  %v1600_v17 = vpop.f32.mrf.mxu0 }
  0xfa   : > { %v1190_v59 = vadd.f32 %v1189_v37, %v3511_v30  ;;  %v358_v37 = vld [vmem:[%s3198_s12 + $0x98] sm:$0x1] }
  0xfb   : > { %v1509_v45 = vadd.f32 %v1508_v7, %v1276_v36  ;;  %v675_v7 = vor.u32 %v674_v40, %v670_v39  ;;  %v806_v36 = vrot.slane %v529_v21, 1  ;;  %v512_v0 = vunpack.c.l.b16 %v358_v37  ;;  %v3025_v37 = vld [vmem:[%s4043_s2 + $0x208] sm:$0xff] }
  0xfc   : > { %1228 = vmatmul.bf16.gmra.mxu1 %v3644_v19  ;;  %1639 = vmatmul.bf16.gmra.mxu0 %v3614_v53 }
  0xfd   : > { %1317 = vmatmul.bf16.gmra.mxu2 %v3648_v18  ;;  %1550 = vmatmul.bf16.gmra.mxu3 %v3213_v12  ;;  %v3655_v62 = vadd.f32 %v1597_v38, %v1509_v45  ;;  %v679_v12 = vrot.slane %v677_v15, 1  ;;  %v805_v38 = vrot.slane %v3335_v50, 1  ;;  %v530_v21 = vpack.c.b16 %v512_v0, %v512_v0 }
  0xfe   : > { %2141 = vmatpush.bf16.msra.mxu0 %v3025_v37  ;;  %v808_v0 = vrot.slane %v3372_v60, 1 }
  0xff   : > { %4079 = vst [vmem:[#allocation20_spill] sm:$0xff] %v3655_v62  ;;  %v3664_v18 = vsel %vm536_vm0, %v675_v7, %v679_v12  ;;  %v689_v12 = vshll.u32 %v530_v21, 16 }
 0x100   : > { %v1278_v55 = vpop.f32.mrf.mxu2  ;;  %v1511_v30 = vpop.f32.mrf.mxu3 }
 0x101   : > { %v1279_v49 = vadd.f32 %v1278_v55, %v1190_v59  ;;  %v1191_v4 = vpop.f32.mrf.mxu1  ;;  %v1602_v10 = vpop.f32.mrf.mxu0 }
 0x102   : > { %v1192_v35 = vadd.f32 %v1191_v4, %v3530_v27  ;;  %v3009_v4 = vld [vmem:[%s4043_s2 + $0x188] sm:$0xff] }
 0x103   : > { %v1512_v56 = vadd.f32 %v1511_v30, %v1279_v49  ;;  %v3668_v30 = vsel %vm771_vm1, %v805_v38, %v806_v36  ;;  %v684_v49 = vshll.u32 %v3372_v60, 16  ;;  %1963 = vmatpush.bf16.msra.mxu2 %v3009_v4 }
 0x105   : > { %v3659_v9 = vadd.f32 %v1600_v17, %v1512_v56  ;;  %v682_v56 = vshrl.u32 %v3372_v60, 16  ;;  %v686_v7 = vrot.slane %v684_v49, 1 }
 0x108   : > { %v1280_v45 = vpop.f32.mrf.mxu2  ;;  %v1513_v62 = vpop.f32.mrf.mxu3 }
 0x109   : > { %v1281_v59 = vadd.f32 %v1280_v45, %v1192_v35  ;;  %v1194_v55 = vpop.f32.mrf.mxu1  ;;  %v1605_v26 = vpop.f32.mrf.mxu0  ;;  %v687_v45 = vor.u32 %v686_v7, %v682_v56  ;;  %v696_v7 = vshll.u32 %v3216_v13, 16 }
 0x10a   : > { %v1195_v27 = vadd.f32 %v1194_v55, %v3541_v47  ;;  %v3017_v47 = vld [vmem:[%s4043_s2 + $0x1c8] sm:$0xff] }
 0x10b   : > { %v1514_v17 = vadd.f32 %v1513_v62, %v1281_v59  ;;  %2052 = vmatpush.bf16.msra.mxu3 %v3017_v47  ;;  %v691_v59 = vrot.slane %v689_v12, 1 }
 0x10c   : > { %1233 = vmatmul.bf16.gmra.mxu1 %v3664_v18  ;;  %1644 = vmatmul.bf16.gmra.mxu0 %v3644_v19 }
 0x10d   : > { %1322 = vmatmul.bf16.gmra.mxu2 %v3668_v30  ;;  %1555 = vmatmul.bf16.gmra.mxu3 %v3277_v32  ;;  %v3681_v62 = vadd.f32 %v1602_v10, %v1514_v17  ;;  %v2977_v10 = vld [vmem:[%s4043_s2 + $0x88] sm:$0xff]  ;;  %v361_v17 = vld [vmem:[%s3198_s12 + $0xa4] sm:$0x1] }
 0x10e   : > { %1681 = vmatpush.bf16.msra.mxu1 %v2977_v10 }
 0x110   : > { %v1283_v39 = vpop.f32.mrf.mxu2  ;;  %v1516_v40 = vpop.f32.mrf.mxu3 }
 0x111   : > { %v1284_v15 = vadd.f32 %v1283_v39, %v1195_v27  ;;  %v1196_v35 = vpop.f32.mrf.mxu1  ;;  %v1607_v32 = vpop.f32.mrf.mxu0  ;;  %v809_v27 = vrot.slane %v530_v21, 1 }
 0x112   : > { %v1197_v38 = vadd.f32 %v1196_v35, %v3566_v8 }
 0x113   : > { %v1517_v36 = vadd.f32 %v1516_v40, %v1284_v15  ;;  %v3696_v40 = vsel %vm536_vm0, %v687_v45, %v691_v59  ;;  %v513_v15 = vunpack.c.l.b16 %v361_v17  ;;  %v3700_v56 = vsel %vm771_vm1, %v808_v0, %v809_v27 }
 0x114   : > { %v694_v45 = vshrl.u32 %v3216_v13, 16  ;;  %v698_v59 = vrot.slane %v696_v7, 1 }
 0x115   : > { %v3691_v55 = vadd.f32 %v1605_v26, %v1517_v36  ;;  %v531_v21 = vpack.c.b16 %v513_v15, %v513_v15 }
 0x117   : > { %4080 = vst [vmem:[#allocation21_spill] sm:$0xff] %v3691_v55  ;;  %v701_v0 = vshll.u32 %v531_v21, 16 }
 0x118   : > { %v1285_v8 = vpop.f32.mrf.mxu2  ;;  %v1518_v49 = vpop.f32.mrf.mxu3 }
 0x119   : > { %v1286_v4 = vadd.f32 %v1285_v8, %v1197_v38  ;;  %v1199_v47 = vpop.f32.mrf.mxu1  ;;  %v1610_v39 = vpop.f32.mrf.mxu0  ;;  %v699_v8 = vor.u32 %v698_v59, %v694_v45 }
 0x11a   : > { %v1200_v35 = vadd.f32 %v1199_v47, %v3583_v57  ;;  %v364_v47 = vld [vmem:[%s3198_s12 + $0xb0] sm:$0x1] }
 0x11b   : > { %v1519_v26 = vadd.f32 %v1518_v49, %v1286_v4  ;;  %v812_v4 = vrot.slane %v531_v21, 1  ;;  %v514_v7 = vunpack.c.l.b16 %v364_v47  ;;  %v3008_v21 = vld [vmem:[%s4043_s2 + $0x180] sm:$0xff] }
 0x11c   : > { %1238 = vmatmul.bf16.gmra.mxu1 %v3696_v40  ;;  %1649 = vmatmul.bf16.gmra.mxu0 %v3664_v18 }
 0x11d   : > { %1327 = vmatmul.bf16.gmra.mxu2 %v3700_v56  ;;  %1560 = vmatmul.bf16.gmra.mxu3 %v3335_v50  ;;  %v3707_v12 = vadd.f32 %v1607_v32, %v1519_v26  ;;  %v703_v50 = vrot.slane %v701_v0, 1  ;;  %v811_v32 = vrot.slane %v3216_v13, 1  ;;  %v532_v13 = vpack.c.b16 %v514_v7, %v514_v7  ;;  %v367_v7 = vld [vmem:[%s3198_s12 + $0xbc] sm:$0x1] }
 0x11e   : > { %1964 = vmatpush.bf16.msra.mxu2 %v3008_v21 }
 0x11f   : > { %4081 = vst [vmem:[#allocation22_spill] sm:$0xff] %v3707_v12  ;;  %v3716_v55 = vsel %vm536_vm0, %v699_v8, %v703_v50  ;;  %v706_v8 = vshrl.u32 %v3280_v33, 16 }
 0x120   : > { %v1288_v38 = vpop.f32.mrf.mxu2  ;;  %v1521_v57 = vpop.f32.mrf.mxu3 }
 0x121   : > { %v1289_v36 = vadd.f32 %v1288_v38, %v1200_v35  ;;  %v1201_v10 = vpop.f32.mrf.mxu1  ;;  %v1612_v37 = vpop.f32.mrf.mxu0 }
 0x122   : > { %v1202_v27 = vadd.f32 %v1201_v10, %v3602_v29  ;;  %v3719_v29 = vsel %vm771_vm1, %v811_v32, %v812_v4  ;;  %v713_v32 = vshll.u32 %v532_v13, 16 }
 0x123   : > { %v1522_v17 = vadd.f32 %v1521_v57, %v1289_v36  ;;  %v3016_v36 = vld [vmem:[%s4043_s2 + $0x1c0] sm:$0xff] }
 0x124   : > { %2053 = vmatpush.bf16.msra.mxu3 %v3016_v36 }
 0x125   : > { %v3711_v49 = vadd.f32 %v1610_v39, %v1522_v17  ;;  %v708_v39 = vshll.u32 %v3280_v33, 16 }
 0x127   : > { %v710_v50 = vrot.slane %v708_v39, 1 }
 0x128   : > { %v1290_v15 = vpop.f32.mrf.mxu2  ;;  %v1523_v26 = vpop.f32.mrf.mxu3 }
 0x129   : > { %v1291_v35 = vadd.f32 %v1290_v15, %v1202_v27  ;;  %v1204_v38 = vpop.f32.mrf.mxu1  ;;  %v1615_v12 = vpop.f32.mrf.mxu0  ;;  %v711_v47 = vor.u32 %v710_v50, %v706_v8  ;;  %v715_v15 = vrot.slane %v713_v32, 1 }
 0x12a   : > { %v1205_v45 = vadd.f32 %v1204_v38, %v3471_v41  ;;  %v3024_v41 = vld [vmem:[%s4043_s2 + $0x200] sm:$0xff]  ;;  %v815_v38 = vrot.slane %v532_v13, 1  ;;  %v720_v13 = vshll.u32 %v3338_v51, 16 }
 0x12b   : > { %v1524_v57 = vadd.f32 %v1523_v26, %v1291_v35  ;;  %2142 = vmatpush.bf16.msra.mxu0 %v3024_v41  ;;  %v814_v35 = vrot.slane %v3280_v33, 1  ;;  %v3757_v33 = vld [vmem:[%s3198_s12 + $0x9c] sm:$0xff] }
 0x12c   : > { %1243 = vmatmul.bf16.gmra.mxu1 %v3716_v55  ;;  %1654 = vmatmul.bf16.gmra.mxu0 %v3696_v40 }
 0x12d   : > { %1332 = vmatmul.bf16.gmra.mxu2 %v3719_v29  ;;  %1565 = vmatmul.bf16.gmra.mxu3 %v3372_v60  ;;  %v3732_v10 = vadd.f32 %v1612_v37, %v1524_v57  ;;  %v2976_v37 = vld [vmem:[%s4043_s2 + $0x80] sm:$0xff]  ;;  %v3751_v8 = vsel %vm771_vm1, %v814_v35, %v815_v38  ;;  %v722_v35 = vrot.slane %v720_v13, 1 }
 0x12e   : > { %1682 = vmatpush.bf16.msra.mxu1 %v2976_v37 }
 0x130   : > { %v1293_v59 = vpop.f32.mrf.mxu2  ;;  %v1526_v0 = vpop.f32.mrf.mxu3 }
 0x131   : > { %v1294_v60 = vadd.f32 %v1293_v59, %v1205_v45  ;;  %v1206_v27 = vpop.f32.mrf.mxu1  ;;  %v1617_v17 = vpop.f32.mrf.mxu0 }
 0x132   : > { %v1207_v57 = vadd.f32 %v1206_v27, %v3496_v58 }
 0x133   : > { %v1527_v4 = vadd.f32 %v1526_v0, %v1294_v60  ;;  %v3748_v0 = vsel %vm536_vm0, %v711_v47, %v715_v15  ;;  %v515_v60 = vunpack.c.l.b16 %v367_v7  ;;  %v718_v15 = vshrl.u32 %v3338_v51, 16 }
 0x135   : > { %v3742_v26 = vadd.f32 %v1615_v12, %v1527_v4  ;;  %v533_v58 = vpack.c.b16 %v515_v60, %v515_v60  ;;  %v370_v60 = vld [vmem:[%s3361_s6 + $0x8] sm:$0x1] }
 0x137   : > { %v725_v38 = vshll.u32 %v533_v58, 16 }
 0x138   : > { %v1295_v39 = vpop.f32.mrf.mxu2  ;;  %v1528_v21 = vpop.f32.mrf.mxu3 }
 0x139   : > { %v1296_v36 = vadd.f32 %v1295_v39, %v1207_v57  ;;  %v1209_v45 = vpop.f32.mrf.mxu1  ;;  %v1620_v59 = vpop.f32.mrf.mxu0  ;;  %v723_v57 = vor.u32 %v722_v35, %v718_v15  ;;  %v727_v39 = vrot.slane %v725_v38, 1 }
 0x13a   : > { %v1210_v50 = vadd.f32 %v1209_v45, %v3513_v16 }
 0x13b   : > { %v1529_v12 = vadd.f32 %v1528_v21, %v1296_v36  ;;  %v818_v36 = vrot.slane %v533_v58, 1  ;;  %v3771_v13 = vsel %vm536_vm0, %v723_v57, %v727_v39 }
 0x13c   : > { %1248 = vmatmul.bf16.gmra.mxu1 %v3748_v0  ;;  %1659 = vmatmul.bf16.gmra.mxu0 %v3716_v55 }
 0x13d   : > { %1337 = vmatmul.bf16.gmra.mxu2 %v3751_v8  ;;  %1570 = vmatmul.bf16.gmra.mxu3 %v3757_v33  ;;  %v3761_v27 = vadd.f32 %v1617_v17, %v1529_v12  ;;  %v817_v17 = vrot.slane %v3338_v51, 1 }
 0x13f   : > { %4082 = vst [vmem:[#allocation23_spill] sm:$0xff] %v3761_v27 }
 0x140   : > { %v1298_v32 = vpop.f32.mrf.mxu2  ;;  %v1531_v4 = vpop.f32.mrf.mxu3 }
 0x141   : > { %v1299_v37 = vadd.f32 %v1298_v32, %v1210_v50  ;;  %v1211_v41 = vpop.f32.mrf.mxu1  ;;  %v1622_v47 = vpop.f32.mrf.mxu0 }
 0x142   : > { %v1212_v16 = vadd.f32 %v1211_v41, %v3532_v28  ;;  %v3780_v28 = vld [vmem:[%s3198_s12 + $0xa8] sm:$0xff]  ;;  %v732_v41 = vshll.u32 %v3375_v61, 16 }
 0x143   : > { %v1532_v7 = vadd.f32 %v1531_v4, %v1299_v37  ;;  %v516_v4 = vunpack.c.l.b16 %v370_v60  ;;  %v3774_v37 = vsel %vm771_vm1, %v817_v17, %v818_v36  ;;  %v730_v36 = vshrl.u32 %v3375_v61, 16 }
 0x144   : > { %4084 = vst [vmem:[#allocation25_spill] sm:$0xff] %v3774_v37  ;;  %v734_v60 = vrot.slane %v732_v41, 1 }
 0x145   : > { %v3765_v21 = vadd.f32 %v1620_v59, %v1532_v7  ;;  %v534_v58 = vpack.c.b16 %v516_v4, %v516_v4  ;;  %v820_v4 = vrot.slane %v3375_v61, 1 }
 0x147   : > { %4083 = vst [vmem:[#allocation24_spill] sm:$0xff] %v3765_v21 }
 0x148   : > { %v1300_v45 = vpop.f32.mrf.mxu2  ;;  %v1533_v12 = vpop.f32.mrf.mxu3 }
 0x149   : > { %v1301_v50 = vadd.f32 %v1300_v45, %v1212_v16  ;;  %v1214_v32 = vpop.f32.mrf.mxu1  ;;  %v1625_v27 = vpop.f32.mrf.mxu0  ;;  %v737_v16 = vshll.u32 %v534_v58, 16 }
 0x14a   : > { %v1215_v35 = vadd.f32 %v1214_v32, %v3543_v52 }
 0x14b   : > { %v1534_v59 = vadd.f32 %v1533_v12, %v1301_v50  ;;  %v735_v12 = vor.u32 %v734_v60, %v730_v36  ;;  %v739_v50 = vrot.slane %v737_v16, 1  ;;  %v773_v16 = vrot.slane %v3385_v3, 1 }
 0x14c   : > { %1253 = vmatmul.bf16.gmra.mxu1 %v3771_v13  ;;  %1664 = vmatmul.bf16.gmra.mxu0 %v3748_v0 }
 0x14d   : > { %1342 = vmatmul.bf16.gmra.mxu2 %v3774_v37  ;;  %1575 = vmatmul.bf16.gmra.mxu3 %v3780_v28  ;;  %v3784_v15 = vadd.f32 %v1622_v47, %v1534_v59  ;;  %v821_v47 = vrot.slane %v534_v58, 1  ;;  %v3793_v37 = vsel %vm536_vm0, %v735_v12, %v739_v50 }
 0x14f   : > { %4085 = vst [vmem:[#allocation26_spill] sm:$0xff] %v3784_v15  ;;  %v3796_v41 = vsel %vm771_vm1, %v820_v4, %v821_v47 }
 0x150   : > { %v1303_v38 = vpop.f32.mrf.mxu2  ;;  %v1536_v7 = vpop.f32.mrf.mxu3 }
 0x151   : > { %v1304_v57 = vadd.f32 %v1303_v38, %v1215_v35  ;;  %v1216_v39 = vpop.f32.mrf.mxu1  ;;  %v1627_v17 = vpop.f32.mrf.mxu0 }
 0x152   : > { %v1217_v59 = vadd.f32 %v1216_v39, %v3568_v31 }
 0x153   : > { %v1537_v45 = vadd.f32 %v1536_v7, %v1304_v57 }
 0x155   : > { %v3788_v21 = vadd.f32 %v1625_v27, %v1537_v45 }
 0x158   : > { %v1305_v52 = vpop.f32.mrf.mxu2  ;;  %v1538_v32 = vpop.f32.mrf.mxu3 }
 0x159   : > { %v1306_v15 = vadd.f32 %v1305_v52, %v1217_v59  ;;  %v1219_v35 = vpop.f32.mrf.mxu1  ;;  %v1630_v38 = vpop.f32.mrf.mxu0  ;;  %v3086_v52 = vld [vmem:[%s3198_s12 + $0x18] sm:$0xff] }
 0x15a   : > { %v1220_v31 = vadd.f32 %v1219_v35, %v3585_v1 }
 0x15b   : > { %v1539_v7 = vadd.f32 %v1538_v32, %v1306_v15  ;;  %v772_v15 = vrot.slane %v3378_v63, 1 }
 0x15c   : > { %1258 = vmatmul.bf16.gmra.mxu1 %v3793_v37  ;;  %1669 = vmatmul.bf16.gmra.mxu0 %v3771_v13 }
 0x15d   : > { %1347 = vmatmul.bf16.gmra.mxu2 %v3796_v41  ;;  %1580 = vmatmul.bf16.gmra.mxu3 %v3338_v51  ;;  %v3802_v61 = vadd.f32 %v1627_v17, %v1539_v7  ;;  %v774_v47 = vsel %vm771_vm1, %v772_v15, %v773_v16 }
 0x160   : > { %v1308_v27 = vpop.f32.mrf.mxu2  ;;  %v1541_v58 = vpop.f32.mrf.mxu3 }
 0x161   : > { %v1309_v57 = vadd.f32 %v1308_v27, %v1220_v31  ;;  %v1221_v39 = vpop.f32.mrf.mxu1  ;;  %v1632_v36 = vpop.f32.mrf.mxu0 }
 0x162   : > { %v1222_v12 = vadd.f32 %v1221_v39, %v3604_v34 }
 0x163   : > { %v1542_v60 = vadd.f32 %v1541_v58, %v1309_v57 }
 0x165   : > { %v3807_v45 = vadd.f32 %v1630_v38, %v1542_v60 }
 0x168   : > { %v1310_v51 = vpop.f32.mrf.mxu2  ;;  %v1543_v17 = vpop.f32.mrf.mxu3 }
 0x169   : > { %v1311_v50 = vadd.f32 %v1310_v51, %v1222_v12  ;;  %v1224_v4 = vpop.f32.mrf.mxu1  ;;  %v1635_v1 = vpop.f32.mrf.mxu0 }
 0x16a   : > { %v1225_v3 = vadd.f32 %v1224_v4, %v3490_v54  ;;  %v3087_v54 = vld [vmem:[%s3198_s12 + $0x24] sm:$0xff] }
 0x16b   : > { %v1544_v59 = vadd.f32 %v1543_v17, %v1311_v50 }
 0x16c   : > { %1683 = vmatmul.bf16.vlgmr.msra.gmra.mxu1 %v774_v47  ;;  %2143 = vmatmul.bf16.vlgmr.msra.gmra.mxu0 %v3420_v46 }
 0x16d   : > { %1965 = vmatmul.bf16.vlgmr.msra.gmra.mxu2 %v3086_v52  ;;  %2054 = vmatmul.bf16.vlgmr.msra.gmra.mxu3 %v3417_v44  ;;  %v3814_v63 = vadd.f32 %v1632_v36, %v1544_v59 }
 0x170   : > { %v1313_v34 = vpop.f32.mrf.mxu2  ;;  %v1546_v32 = vpop.f32.mrf.mxu3 }
 0x171   : > { %v1314_v35 = vadd.f32 %v1313_v34, %v1225_v3  ;;  %v1226_v38 = vpop.f32.mrf.mxu1  ;;  %v1637_v7 = vpop.f32.mrf.mxu0 }
 0x172   : > { %v1227_v58 = vadd.f32 %v1226_v38, %v3507_v14 }
 0x173   : > { %v1547_v31 = vadd.f32 %v1546_v32, %v1314_v35 }
 0x175   : > { %v3817_v27 = vadd.f32 %v1635_v1, %v1547_v31 }
 0x178   : > { %v1315_v57 = vpop.f32.mrf.mxu2  ;;  %v1548_v39 = vpop.f32.mrf.mxu3 }
 0x179   : > { %v1316_v60 = vadd.f32 %v1315_v57, %v1227_v58  ;;  %v1229_v15 = vpop.f32.mrf.mxu1  ;;  %v1640_v44 = vpop.f32.mrf.mxu0 }
 0x17a   : > { %v1230_v12 = vadd.f32 %v1229_v15, %v3526_v23  ;;  %v3088_v23 = vld [vmem:[%s3198_s12 + $0x30] sm:$0xff] }
 0x17b   : > { %v1549_v36 = vadd.f32 %v1548_v39, %v1316_v60 }
 0x17c   : > { %1688 = vmatmul.bf16.gmra.mxu1 %v3396_v25  ;;  %2148 = vmatmul.bf16.gmra.mxu0 %v3433_v5 }
 0x17d   : > { %1970 = vmatmul.bf16.gmra.mxu2 %v3087_v54  ;;  %2059 = vmatmul.bf16.gmra.mxu3 %v3430_v2  ;;  %v3824_v16 = vadd.f32 %v1637_v7, %v1549_v36 }
 0x180   : > { %v1318_v51 = vpop.f32.mrf.mxu2  ;;  %v1551_v14 = vpop.f32.mrf.mxu3 }
 0x181   : > { %v1319_v17 = vadd.f32 %v1318_v51, %v1230_v12  ;;  %v1231_v50 = vpop.f32.mrf.mxu1  ;;  %v1642_v4 = vpop.f32.mrf.mxu0 }
 0x182   : > { %v1232_v25 = vadd.f32 %v1231_v50, %v3537_v48 }
 0x183   : > { %v1552_v1 = vadd.f32 %v1551_v14, %v1319_v17 }
 0x185   : > { %v3827_v47 = vadd.f32 %v1640_v44, %v1552_v1 }
 0x188   : > { %v1320_v59 = vpop.f32.mrf.mxu2  ;;  %v1553_v52 = vpop.f32.mrf.mxu3 }
 0x189   : > { %v1321_v3 = vadd.f32 %v1320_v59, %v1232_v25  ;;  %v1234_v34 = vpop.f32.mrf.mxu1  ;;  %v1645_v2 = vpop.f32.mrf.mxu0 }
 0x18a   : > { %v1235_v38 = vadd.f32 %v1234_v34, %v3562_v6  ;;  %v3089_v6 = vld [vmem:[%s3198_s12 + $0x3c] sm:$0xff] }
 0x18b   : > { %v1554_v32 = vadd.f32 %v1553_v52, %v1321_v3 }
 0x18c   : > { %1693 = vmatmul.bf16.gmra.mxu1 %v3420_v46  ;;  %2153 = vmatmul.bf16.gmra.mxu0 %v3459_v24 }
 0x18d   : > { %1975 = vmatmul.bf16.gmra.mxu2 %v3088_v23  ;;  %2064 = vmatmul.bf16.gmra.mxu3 %v3456_v22  ;;  %v3834_v35 = vadd.f32 %v1642_v4, %v1554_v32 }
 0x190   : > { %v1323_v7 = vpop.f32.mrf.mxu2  ;;  %v1556_v48 = vpop.f32.mrf.mxu3 }
 0x191   : > { %v1324_v31 = vadd.f32 %v1323_v7, %v1235_v38  ;;  %v1236_v58 = vpop.f32.mrf.mxu1  ;;  %v1647_v57 = vpop.f32.mrf.mxu0  ;;  %v3090_v38 = vld [vmem:[%s3198_s12 + $0x48] sm:$0xff]  ;;  %v4088_v7 = vld [vmem:[#allocation4_spill] sm:$0xff] }
 0x192   : > { %v1237_v46 = vadd.f32 %v1236_v58, %v3579_v11 }
 0x193   : > { %v1557_v39 = vadd.f32 %v1556_v48, %v1324_v31  ;;  %v4089_v31 = vld [vmem:[#allocation2_spill] sm:$0xff] }
 0x195   : > { %v3837_v60 = vadd.f32 %v1645_v2, %v1557_v39 }
 0x198   : > { %v1325_v15 = vpop.f32.mrf.mxu2  ;;  %v1558_v44 = vpop.f32.mrf.mxu3 }
 0x199   : > { %v1326_v36 = vadd.f32 %v1325_v15, %v1237_v46  ;;  %v1239_v54 = vpop.f32.mrf.mxu1  ;;  %v1650_v22 = vpop.f32.mrf.mxu0 }
 0x19a   : > { %v1240_v14 = vadd.f32 %v1239_v54, %v3598_v20  ;;  %v4087_v20 = vld [vmem:[#allocation5_spill] sm:$0xff] }
 0x19b   : > { %v1559_v12 = vadd.f32 %v1558_v44, %v1326_v36 }
 0x19c   : > { %1698 = vmatmul.bf16.gmra.mxu1 %v3433_v5  ;;  %2158 = vmatmul.bf16.gmra.mxu0 %v3477_v43  ;;  %v4086_v5 = vld [vmem:[#allocation15_spill] sm:$0xff] }
 0x19d   : > { %1980 = vmatmul.bf16.gmra.mxu2 %v3089_v6  ;;  %2069 = vmatmul.bf16.gmra.mxu3 %v3474_v42  ;;  %v3844_v51 = vadd.f32 %v1647_v57, %v1559_v12 }
 0x1a0   : > { %v1328_v17 = vpop.f32.mrf.mxu2  ;;  %v1561_v11 = vpop.f32.mrf.mxu3 }
 0x1a1   : > { %v1329_v50 = vadd.f32 %v1328_v17, %v1240_v14  ;;  %v1241_v4 = vpop.f32.mrf.mxu1  ;;  %v1652_v1 = vpop.f32.mrf.mxu0 }
 0x1a2   : > { %v1242_v52 = vadd.f32 %v1241_v4, %v4086_v5  ;;  %v4091_v4 = vld [vmem:[#allocation9_spill] sm:$0xff] }
 0x1a3   : > { %v1562_v25 = vadd.f32 %v1561_v11, %v1329_v50 }
 0x1a5   : > { %v3847_v59 = vadd.f32 %v1650_v22, %v1562_v25  ;;  %v4092_v25 = vld [vmem:[#allocation8_spill] sm:$0xff] }
 0x1a8   : > { %v1330_v3 = vpop.f32.mrf.mxu2  ;;  %v1563_v34 = vpop.f32.mrf.mxu3 }
 0x1a9   : > { %v1331_v2 = vadd.f32 %v1330_v3, %v1242_v52  ;;  %v1244_v32 = vpop.f32.mrf.mxu1  ;;  %v1655_v42 = vpop.f32.mrf.mxu0  ;;  %v4093_v52 = vld [vmem:[#allocation6_spill] sm:$0xff] }
 0x1aa   : > { %v1245_v58 = vadd.f32 %v1244_v32, %v4089_v31 }
 0x1ab   : > { %v1564_v23 = vadd.f32 %v1563_v34, %v1331_v2 }
 0x1ac   : > { %1703 = vmatmul.bf16.gmra.mxu1 %v3459_v24  ;;  %2163 = vmatmul.bf16.gmra.mxu0 %v4087_v20  ;;  %v4090_v24 = vld [vmem:[#allocation3_spill] sm:$0xff] }
 0x1ad   : > { %1985 = vmatmul.bf16.gmra.mxu2 %v3090_v38  ;;  %2074 = vmatmul.bf16.gmra.mxu3 %v4088_v7  ;;  %v3854_v48 = vadd.f32 %v1652_v1, %v1564_v23  ;;  %v3091_v1 = vld [vmem:[%s3198_s12 + $0x54] sm:$0xff] }
 0x1b0   : > { %v1333_v57 = vpop.f32.mrf.mxu2  ;;  %v1566_v39 = vpop.f32.mrf.mxu3 }
 0x1b1   : > { %v1334_v46 = vadd.f32 %v1333_v57, %v1245_v58  ;;  %v1246_v15 = vpop.f32.mrf.mxu1  ;;  %v1657_v44 = vpop.f32.mrf.mxu0 }
 0x1b2   : > { %v1247_v22 = vadd.f32 %v1246_v15, %v4090_v24  ;;  %v3092_v24 = vld [vmem:[%s3198_s12 + $0x60] sm:$0xff] }
 0x1b3   : > { %v1567_v36 = vadd.f32 %v1566_v39, %v1334_v46 }
 0x1b5   : > { %v3857_v54 = vadd.f32 %v1655_v42, %v1567_v36  ;;  %v4095_v36 = vld [vmem:[#allocation13_spill] sm:$0xff] }
 0x1b8   : > { %v1335_v12 = vpop.f32.mrf.mxu2  ;;  %v1568_v6 = vpop.f32.mrf.mxu3 }
 0x1b9   : > { %v1336_v14 = vadd.f32 %v1335_v12, %v1247_v22  ;;  %v1249_v17 = vpop.f32.mrf.mxu1  ;;  %v1660_v11 = vpop.f32.mrf.mxu0  ;;  %v4096_v22 = vld [vmem:[#allocation12_spill] sm:$0xff] }
 0x1ba   : > { %v1250_v3 = vadd.f32 %v1249_v17, %v4093_v52 }
 0x1bb   : > { %v1569_v50 = vadd.f32 %v1568_v6, %v1336_v14  ;;  %v4097_v6 = vld [vmem:[#allocation10_spill] sm:$0xff] }
 0x1bc   : > { %1708 = vmatmul.bf16.gmra.mxu1 %v3477_v43  ;;  %2168 = vmatmul.bf16.gmra.mxu0 %v4091_v4  ;;  %v4094_v43 = vld [vmem:[#allocation7_spill] sm:$0xff] }
 0x1bd   : > { %1990 = vmatmul.bf16.gmra.mxu2 %v3091_v1  ;;  %2079 = vmatmul.bf16.gmra.mxu3 %v4092_v25  ;;  %v3864_v5 = vadd.f32 %v1657_v44, %v1569_v50 }
 0x1c0   : > { %v1338_v34 = vpop.f32.mrf.mxu2  ;;  %v1571_v2 = vpop.f32.mrf.mxu3 }
 0x1c1   : > { %v1339_v32 = vadd.f32 %v1338_v34, %v1250_v3  ;;  %v1251_v42 = vpop.f32.mrf.mxu1  ;;  %v1662_v23 = vpop.f32.mrf.mxu0 }
 0x1c2   : > { %v1252_v31 = vadd.f32 %v1251_v42, %v4094_v43 }
 0x1c3   : > { %v1572_v38 = vadd.f32 %v1571_v2, %v1339_v32 }
 0x1c5   : > { %v3867_v7 = vadd.f32 %v1660_v11, %v1572_v38 }
 0x1c8   : > { %v1340_v58 = vpop.f32.mrf.mxu2  ;;  %v1573_v57 = vpop.f32.mrf.mxu3 }
 0x1c9   : > { %v1341_v39 = vadd.f32 %v1340_v58, %v1252_v31  ;;  %v1254_v46 = vpop.f32.mrf.mxu1  ;;  %v1665_v15 = vpop.f32.mrf.mxu0  ;;  %v4099_v31 = vld [vmem:[#allocation17_spill] sm:$0xff]  ;;  %v3093_v58 = vld [vmem:[%s3198_s12 + $0x6c] sm:$0xff] }
 0x1ca   : > { %v1255_v14 = vadd.f32 %v1254_v46, %v4097_v6 }
 0x1cb   : > { %v1574_v44 = vadd.f32 %v1573_v57, %v1341_v39  ;;  %v4100_v39 = vld [vmem:[#allocation14_spill] sm:$0xff] }
 0x1cc   : > { %1713 = vmatmul.bf16.gmra.mxu1 %v4087_v20  ;;  %2173 = vmatmul.bf16.gmra.mxu0 %v4095_v36  ;;  %v4098_v20 = vld [vmem:[#allocation11_spill] sm:$0xff] }
 0x1cd   : > { %1995 = vmatmul.bf16.gmra.mxu2 %v3092_v24  ;;  %2084 = vmatmul.bf16.gmra.mxu3 %v4096_v22  ;;  %v3874_v12 = vadd.f32 %v1662_v23, %v1574_v44 }
 0x1d0   : > { %v1343_v17 = vpop.f32.mrf.mxu2  ;;  %v1576_v11 = vpop.f32.mrf.mxu3 }
 0x1d1   : > { %v1344_v50 = vadd.f32 %v1343_v17, %v1255_v14  ;;  %v1256_v1 = vpop.f32.mrf.mxu1  ;;  %v1667_v25 = vpop.f32.mrf.mxu0 }
 0x1d2   : > { %v1257_v34 = vadd.f32 %v1256_v1, %v4098_v20 }
 0x1d3   : > { %v1577_v52 = vadd.f32 %v1576_v11, %v1344_v50 }
 0x1d5   : > { %v3877_v3 = vadd.f32 %v1665_v15, %v1577_v52 }
 0x1d8   : > { %v1345_v2 = vpop.f32.mrf.mxu2  ;;  %v1578_v32 = vpop.f32.mrf.mxu3 }
 0x1d9   : > { %v1346_v42 = vadd.f32 %v1345_v2, %v1257_v34  ;;  %v1259_v38 = vpop.f32.mrf.mxu1  ;;  %v1670_v43 = vpop.f32.mrf.mxu0  ;;  %v4102_v34 = vld [vmem:[#allocation19_spill] sm:$0xff]  ;;  %v3094_v2 = vld [vmem:[%s3198_s12 + $0x78] sm:$0xff] }
 0x1da   : > { %v1260_v46 = vadd.f32 %v1259_v38, %v4100_v39  ;;  %v4103_v39 = vld [vmem:[#allocation18_spill] sm:$0xff] }
 0x1db   : > { %v1579_v23 = vadd.f32 %v1578_v32, %v1346_v42 }
 0x1dc   : > { %1718 = vmatmul.bf16.gmra.mxu1 %v4091_v4  ;;  %2178 = vmatmul.bf16.gmra.mxu0 %v4099_v31  ;;  %v4101_v4 = vld [vmem:[#allocation16_spill] sm:$0xff] }
 0x1dd   : > { %2000 = vmatmul.bf16.gmra.mxu2 %v3093_v58  ;;  %2089 = vmatmul.bf16.gmra.mxu3 %v3614_v53  ;;  %v3884_v57 = vadd.f32 %v1667_v25, %v1579_v23 }
 0x1e0   : > { %v1348_v15 = vpop.f32.mrf.mxu2  ;;  %v1581_v44 = vpop.f32.mrf.mxu3 }
 0x1e1   : > { %v1349_v24 = vadd.f32 %v1348_v15, %v1260_v46  ;;  %v1261_v22 = vpop.f32.mrf.mxu1  ;;  %v1672_v6 = vpop.f32.mrf.mxu0 }
 0x1e2   : > { %v1262_v11 = vadd.f32 %v1261_v22, %v4101_v4 }
 0x1e3   : > { %v1582_v14 = vadd.f32 %v1581_v44, %v1349_v24 }
 0x1e5   : > { %v3887_v17 = vadd.f32 %v1670_v43, %v1582_v14 }
 0x1e8   : > { %v1350_v50 = vpop.f32.mrf.mxu2  ;;  %v1583_v1 = vpop.f32.mrf.mxu3 }
 0x1e9   : > { %v1351_v52 = vadd.f32 %v1350_v50, %v1262_v11  ;;  %v1684_v20 = vpop.f32.mrf.mxu1  ;;  %v2144_v53 = vpop.f32.mrf.mxu0  ;;  %v4104_v50 = vld [vmem:[#allocation20_spill] sm:$0xff] }
 0x1ea   : > { %v1685_v46 = vadd.f32 %v1684_v20, %v4103_v39 }
 0x1eb   : > { %v1584_v25 = vadd.f32 %v1583_v1, %v1351_v52 }
 0x1ec   : > { %1723 = vmatmul.bf16.gmra.mxu1 %v4095_v36  ;;  %2183 = vmatmul.bf16.gmra.mxu0 %v4102_v34  ;;  %v3900_v36 = vld [vmem:[%s4044_s3] ss:$0 sm:$0xff] }
 0x1ed   : > { %2005 = vmatmul.bf16.gmra.mxu2 %v3094_v2  ;;  %2094 = vmatmul.bf16.gmra.mxu3 %v3644_v19  ;;  %v3894_v32 = vadd.f32 %v1672_v6, %v1584_v25 }
 0x1f0   : > { %v1966_v42 = vpop.f32.mrf.mxu2  ;;  %v2055_v38 = vpop.f32.mrf.mxu3 }
 0x1f1   : > { %v2056_v43 = vadd.f32 %v2055_v38, %v1966_v42  ;;  %v1686_v23 = vpop.f32.mrf.mxu1  ;;  %v2146_v58 = vpop.f32.mrf.mxu0 }
 0x1f2   : > { %v1687_v1 = vadd.f32 %v1686_v23, %v4104_v50 }
 0x1f3   : > { %v2145_v15 = vadd.f32 %v2144_v53, %v2056_v43  ;;  %v3095_v53 = vld [vmem:[%s3198_s12 + $0x84] sm:$0xff] }
 0x1f5   : > { %v2224_v44 = vadd.f32 %v2145_v15, %v1685_v46 }
 0x1f7   : > { %v2259_v19 = vadd.f32 %v3900_v36, %v2224_v44 }
 0x1f8   : > { %v1968_v24 = vpop.f32.mrf.mxu2  ;;  %v2057_v22 = vpop.f32.mrf.mxu3 }
 0x1f9   : > { %v2291_v6 = vmax.f32 %v2259_v19, 0.0  ;;  %v2058_v14 = vadd.f32 %v2057_v22, %v1968_v24  ;;  %v1689_v4 = vpop.f32.mrf.mxu1  ;;  %v2149_v11 = vpop.f32.mrf.mxu0 }
 0x1fa   : > { %v1690_v23 = vadd.f32 %v1689_v4, %v3659_v9  ;;  %v3096_v4 = vld [vmem:[%s3198_s12 + $0x90] sm:$0xff] }
 0x1fb   : > { %2323 = vst [vmem:[%s3907_s8] sm:$0xff] %v2291_v6  ;;  %v2147_v52 = vadd.f32 %v2146_v58, %v2058_v14 }
 0x1fc   : > { %1728 = vmatmul.bf16.gmra.mxu1 %v4099_v31  ;;  %2188 = vmatmul.bf16.gmra.mxu0 %v3668_v30 }
 0x1fd   : > { %v2225_v20 = vadd.f32 %v2147_v52, %v1687_v1  ;;  %2010 = vmatmul.bf16.gmra.mxu2 %v3095_v53  ;;  %2099 = vmatmul.bf16.gmra.mxu3 %v3664_v18 }
 0x1ff   : > { %v2260_v25 = vadd.f32 %v3900_v36, %v2225_v20 }
 0x200   : > { %v1971_v2 = vpop.f32.mrf.mxu2  ;;  %v2060_v42 = vpop.f32.mrf.mxu3 }
 0x201   : > { %v2292_v38 = vmax.f32 %v2260_v25, 0.0  ;;  %v2061_v43 = vadd.f32 %v2060_v42, %v1971_v2  ;;  %v1691_v39 = vpop.f32.mrf.mxu1  ;;  %v2151_v46 = vpop.f32.mrf.mxu0 }
 0x202   : > { %v1692_v14 = vadd.f32 %v1691_v39, %v3681_v62  ;;  %v4105_v62 = vld [vmem:[#allocation21_spill] sm:$0xff] }
 0x203   : > { %2324 = vst [vmem:[%s3907_s8 + $0x8] sm:$0xff] %v2292_v38  ;;  %v2150_v31 = vadd.f32 %v2149_v11, %v2061_v43 }
 0x205   : > { %v2226_v58 = vadd.f32 %v2150_v31, %v1690_v23 }
 0x207   : > { %v2261_v15 = vadd.f32 %v3900_v36, %v2226_v58 }
 0x208   : > { %v1973_v44 = vpop.f32.mrf.mxu2  ;;  %v2062_v19 = vpop.f32.mrf.mxu3 }
 0x209   : > { %v2293_v18 = vmax.f32 %v2261_v15, 0.0  ;;  %v2063_v24 = vadd.f32 %v2062_v19, %v1973_v44  ;;  %v1694_v22 = vpop.f32.mrf.mxu1  ;;  %v2154_v6 = vpop.f32.mrf.mxu0  ;;  %v4106_v15 = vld [vmem:[#allocation22_spill] sm:$0xff] }
 0x20a   : > { %v1695_v42 = vadd.f32 %v1694_v22, %v4105_v62 }
 0x20b   : > { %2325 = vst [vmem:[%s3907_s8 + $0x10] sm:$0xff] %v2293_v18  ;;  %v2152_v50 = vadd.f32 %v2151_v46, %v2063_v24 }
 0x20c   : > { %1733 = vmatmul.bf16.gmra.mxu1 %v4102_v34  ;;  %2193 = vmatmul.bf16.gmra.mxu0 %v3700_v56 }
 0x20d   : > { %v2227_v9 = vadd.f32 %v2152_v50, %v1692_v14  ;;  %2015 = vmatmul.bf16.gmra.mxu2 %v3096_v4  ;;  %2104 = vmatmul.bf16.gmra.mxu3 %v3696_v40 }
 0x20f   : > { %v2262_v11 = vadd.f32 %v3900_v36, %v2227_v9 }
 0x210   : > { %v1976_v1 = vpop.f32.mrf.mxu2  ;;  %v2065_v52 = vpop.f32.mrf.mxu3 }
 0x211   : > { %v2294_v20 = vmax.f32 %v2262_v11, 0.0  ;;  %v2066_v53 = vadd.f32 %v2065_v52, %v1976_v1  ;;  %v1696_v25 = vpop.f32.mrf.mxu1  ;;  %v2156_v2 = vpop.f32.mrf.mxu0 }
 0x212   : > { %v1697_v44 = vadd.f32 %v1696_v25, %v4106_v15 }
 0x213   : > { %2326 = vst [vmem:[%s3907_s8 + $0x18] sm:$0xff] %v2294_v20  ;;  %v2155_v34 = vadd.f32 %v2154_v6, %v2066_v53 }
 0x215   : > { %v2228_v38 = vadd.f32 %v2155_v34, %v1695_v42 }
 0x217   : > { %v2263_v43 = vadd.f32 %v3900_v36, %v2228_v38 }
 0x218   : > { %v1978_v39 = vpop.f32.mrf.mxu2  ;;  %v2067_v46 = vpop.f32.mrf.mxu3 }
 0x219   : > { %v2295_v23 = vmax.f32 %v2263_v43, 0.0  ;;  %v2068_v40 = vadd.f32 %v2067_v46, %v1978_v39  ;;  %v1699_v31 = vpop.f32.mrf.mxu1  ;;  %v2159_v58 = vpop.f32.mrf.mxu0 }
 0x21a   : > { %v1700_v11 = vadd.f32 %v1699_v31, %v3711_v49 }
 0x21b   : > { %2327 = vst [vmem:[%s3907_s8 + $0x20] sm:$0xff] %v2295_v23  ;;  %v2157_v19 = vadd.f32 %v2156_v2, %v2068_v40 }
 0x21c   : > { %1738 = vmatmul.bf16.gmra.mxu1 %v3668_v30  ;;  %2198 = vmatmul.bf16.gmra.mxu0 %v3719_v29 }
 0x21d   : > { %v2229_v18 = vadd.f32 %v2157_v19, %v1697_v44  ;;  %2020 = vmatmul.bf16.gmra.mxu2 %v3757_v33  ;;  %2109 = vmatmul.bf16.gmra.mxu3 %v3716_v55 }
 0x21f   : > { %v2264_v24 = vadd.f32 %v3900_v36, %v2229_v18 }
 0x220   : > { %v1981_v22 = vpop.f32.mrf.mxu2  ;;  %v2070_v6 = vpop.f32.mrf.mxu3 }
 0x221   : > { %v2296_v14 = vmax.f32 %v2264_v24, 0.0  ;;  %v2071_v50 = vadd.f32 %v2070_v6, %v1981_v22  ;;  %v1701_v9 = vpop.f32.mrf.mxu1  ;;  %v2161_v4 = vpop.f32.mrf.mxu0  ;;  %v4107_v24 = vld [vmem:[#allocation23_spill] sm:$0xff] }
 0x222   : > { %v1702_v62 = vadd.f32 %v1701_v9, %v3732_v10 }
 0x223   : > { %2328 = vst [vmem:[%s3907_s8 + $0x28] sm:$0xff] %v2296_v14  ;;  %v2160_v30 = vadd.f32 %v2159_v58, %v2071_v50  ;;  %v4108_v14 = vld [vmem:[#allocation25_spill] sm:$0xff] }
 0x224   : > { %v3097_v50 = vld [vmem:[%s3198_s12 + $0xb4] sm:$0xff] }
 0x225   : > { %v2230_v1 = vadd.f32 %v2160_v30, %v1700_v11 }
 0x227   : > { %v2265_v52 = vadd.f32 %v3900_v36, %v2230_v1 }
 0x228   : > { %v1983_v20 = vpop.f32.mrf.mxu2  ;;  %v2072_v33 = vpop.f32.mrf.mxu3 }
 0x229   : > { %v2297_v53 = vmax.f32 %v2265_v52, 0.0  ;;  %v2073_v55 = vadd.f32 %v2072_v33, %v1983_v20  ;;  %v1704_v25 = vpop.f32.mrf.mxu1  ;;  %v2164_v2 = vpop.f32.mrf.mxu0 }
 0x22a   : > { %v1705_v10 = vadd.f32 %v1704_v25, %v3742_v26 }
 0x22b   : > { %2329 = vst [vmem:[%s3907_s8 + $0x30] sm:$0xff] %v2297_v53  ;;  %v2162_v42 = vadd.f32 %v2161_v4, %v2073_v55 }
 0x22c   : > { %1743 = vmatmul.bf16.gmra.mxu1 %v3700_v56  ;;  %2203 = vmatmul.bf16.gmra.mxu0 %v3751_v8 }
 0x22d   : > { %v2231_v49 = vadd.f32 %v2162_v42, %v1702_v62  ;;  %2025 = vmatmul.bf16.gmra.mxu2 %v3780_v28  ;;  %2114 = vmatmul.bf16.gmra.mxu3 %v3748_v0 }
 0x22f   : > { %v2266_v34 = vadd.f32 %v3900_v36, %v2231_v49 }
 0x230   : > { %v1986_v38 = vpop.f32.mrf.mxu2  ;;  %v2075_v43 = vpop.f32.mrf.mxu3 }
 0x231   : > { %v2298_v39 = vmax.f32 %v2266_v34, 0.0  ;;  %v2076_v46 = vadd.f32 %v2075_v43, %v1986_v38  ;;  %v1706_v23 = vpop.f32.mrf.mxu1  ;;  %v2166_v40 = vpop.f32.mrf.mxu0  ;;  %v2959_v43 = vld [vmem:[%s3361_s6 + $0xc] sm:$0xff] }
 0x232   : > { %v1707_v22 = vadd.f32 %v1706_v23, %v4107_v24 }
 0x233   : > { %2330 = vst [vmem:[%s3907_s8 + $0x38] sm:$0xff] %v2298_v39  ;;  %v2165_v56 = vadd.f32 %v2164_v2, %v2076_v46  ;;  %v373_v2 = vld [vmem:[%s3361_s6 + $0x14] sm:$0x1]  ;;  %v4110_v46 = vld [vmem:[#allocation26_spill] sm:$0xff] }
 0x234   : > { %v517_v39 = vunpack.c.l.b16 %v373_v2 }
 0x235   : > { %v2232_v31 = vadd.f32 %v2165_v56, %v1705_v10  ;;  %v3098_v56 = vld [vmem:[%s3361_s6] sm:$0xff] }
 0x237   : > { %v2267_v58 = vadd.f32 %v3900_v36, %v2232_v31  ;;  %v535_v31 = vpack.c.b16 %v517_v39, %v517_v39 }
 0x238   : > { %v1988_v28 = vpop.f32.mrf.mxu2  ;;  %v2077_v15 = vpop.f32.mrf.mxu3 }
 0x239   : > { %v2299_v0 = vmax.f32 %v2267_v58, 0.0  ;;  %v2078_v44 = vadd.f32 %v2077_v15, %v1988_v28  ;;  %v1709_v19 = vpop.f32.mrf.mxu1  ;;  %v2169_v18 = vpop.f32.mrf.mxu0  ;;  %v744_v58 = vshll.u32 %v2959_v43, 16 }
 0x23b   : > { %2331 = vst [vmem:[%s3907_s8 + $0x40] sm:$0xff] %v2299_v0  ;;  %v2167_v6 = vadd.f32 %v2166_v40, %v2078_v44 }
 0x23c   : > { %1748 = vmatmul.bf16.gmra.mxu1 %v3719_v29  ;;  %2208 = vmatmul.bf16.gmra.mxu0 %v4108_v14  ;;  %v4109_v29 = vld [vmem:[#allocation24_spill] sm:$0xff] }
 0x23d   : > { %v2233_v26 = vadd.f32 %v2167_v6, %v1707_v22  ;;  %2030 = vmatmul.bf16.gmra.mxu2 %v3097_v50  ;;  %2119 = vmatmul.bf16.gmra.mxu3 %v3771_v13  ;;  %v1710_v33 = vadd.f32 %v1709_v19, %v4109_v29  ;;  %v742_v22 = vshrl.u32 %v2959_v43, 16  ;;  %v749_v6 = vshll.u32 %v535_v31, 16 }
 0x23f   : > { %v2268_v9 = vadd.f32 %v3900_v36, %v2233_v26 }
 0x240   : > { %v1991_v4 = vpop.f32.mrf.mxu2  ;;  %v2080_v11 = vpop.f32.mrf.mxu3 }
 0x241   : > { %v2300_v30 = vmax.f32 %v2268_v9, 0.0  ;;  %v2081_v1 = vadd.f32 %v2080_v11, %v1991_v4  ;;  %v1711_v52 = vpop.f32.mrf.mxu1  ;;  %v2171_v20 = vpop.f32.mrf.mxu0  ;;  %v824_v9 = vrot.slane %v535_v31, 1  ;;  %v751_v11 = vrot.slane %v749_v6, 1 }
 0x242   : > { %v1712_v23 = vadd.f32 %v1711_v52, %v4110_v46 }
 0x243   : > { %2332 = vst [vmem:[%s3907_s8 + $0x48] sm:$0xff] %v2300_v30  ;;  %v2170_v53 = vadd.f32 %v2169_v18, %v2081_v1 }
 0x245   : > { %v2234_v55 = vadd.f32 %v2170_v53, %v1710_v33 }
 0x247   : > { %v2269_v25 = vadd.f32 %v3900_v36, %v2234_v55 }
 0x248   : > { %v1993_v13 = vpop.f32.mrf.mxu2  ;;  %v2082_v62 = vpop.f32.mrf.mxu3 }
 0x249   : > { %v2301_v42 = vmax.f32 %v2269_v25, 0.0  ;;  %v2083_v49 = vadd.f32 %v2082_v62, %v1993_v13  ;;  %v1714_v34 = vpop.f32.mrf.mxu1  ;;  %v2174_v38 = vpop.f32.mrf.mxu0 }
 0x24b   : > { %2333 = vst [vmem:[%s3907_s8 + $0x50] sm:$0xff] %v2301_v42  ;;  %v2172_v40 = vadd.f32 %v2171_v20, %v2083_v49 }
 0x24c   : > { %1753 = vmatmul.bf16.gmra.mxu1 %v3751_v8  ;;  %2213 = vmatmul.bf16.gmra.mxu0 %v3796_v41  ;;  %v746_v8 = vrot.slane %v744_v58, 1  ;;  %v1715_v41 = vadd.f32 %v1714_v34, %v3788_v21 }
 0x24d   : > { %v2235_v10 = vadd.f32 %v2172_v40, %v1712_v23  ;;  %2035 = vmatmul.bf16.gmra.mxu2 %v3098_v56  ;;  %2124 = vmatmul.bf16.gmra.mxu3 %v3793_v37  ;;  %v823_v37 = vrot.slane %v2959_v43, 1 }
 0x24e   : > { %v747_v4 = vor.u32 %v746_v8, %v742_v22 }
 0x24f   : > { %v2270_v28 = vadd.f32 %v3900_v36, %v2235_v10  ;;  %v825_v55 = vsel %vm771_vm1, %v823_v37, %v824_v9 }
 0x250   : > { %v1996_v15 = vpop.f32.mrf.mxu2  ;;  %v2085_v0 = vpop.f32.mrf.mxu3  ;;  %v752_v25 = vsel %vm536_vm0, %v747_v4, %v751_v11 }
 0x251   : > { %v2302_v44 = vmax.f32 %v2270_v28, 0.0  ;;  %v2086_v19 = vadd.f32 %v2085_v0, %v1996_v15  ;;  %v1716_v18 = vpop.f32.mrf.mxu1  ;;  %v2176_v24 = vpop.f32.mrf.mxu0 }
 0x252   : > { %v1717_v21 = vadd.f32 %v1716_v18, %v3802_v61 }
 0x253   : > { %2334 = vst [vmem:[%s3907_s8 + $0x58] sm:$0xff] %v2302_v44  ;;  %v2175_v26 = vadd.f32 %v2174_v38, %v2086_v19 }
 0x255   : > { %v2236_v50 = vadd.f32 %v2175_v26, %v1715_v41 }
 0x257   : > { %v2271_v30 = vadd.f32 %v3900_v36, %v2236_v50 }
 0x258   : > { %v1998_v1 = vpop.f32.mrf.mxu2  ;;  %v2087_v52 = vpop.f32.mrf.mxu3 }
 0x259   : > { %v2303_v20 = vmax.f32 %v2271_v30, 0.0  ;;  %v2088_v29 = vadd.f32 %v2087_v52, %v1998_v1  ;;  %v1719_v33 = vpop.f32.mrf.mxu1  ;;  %v2179_v53 = vpop.f32.mrf.mxu0 }
 0x25a   : > { %v1720_v23 = vadd.f32 %v1719_v33, %v3807_v45 }
 0x25b   : > { %2335 = vst [vmem:[%s3907_s8 + $0x60] sm:$0xff] %v2303_v20  ;;  %v2177_v2 = vadd.f32 %v2176_v24, %v2088_v29 }
 0x25c   : > { %1758 = vmatmul.bf16.gmra.mxu1 %v4108_v14  ;;  %2218 = vmatmul.bf16.gmra.mxu0 %v825_v55 }
 0x25d   : > { %v2237_v13 = vadd.f32 %v2177_v2, %v1717_v21  ;;  %2040 = vmatmul.bf16.gmra.mxu2 %v2959_v43  ;;  %2129 = vmatmul.bf16.gmra.mxu3 %v752_v25 }
 0x25f   : > { %v2272_v62 = vadd.f32 %v3900_v36, %v2237_v13 }
 0x260   : > { %v2001_v42 = vpop.f32.mrf.mxu2  ;;  %v2090_v49 = vpop.f32.mrf.mxu3 }
 0x261   : > { %v2304_v34 = vmax.f32 %v2272_v62, 0.0  ;;  %v2091_v38 = vadd.f32 %v2090_v49, %v2001_v42  ;;  %v1721_v39 = vpop.f32.mrf.mxu1  ;;  %v2181_v46 = vpop.f32.mrf.mxu0 }
 0x262   : > { %v1722_v15 = vadd.f32 %v1721_v39, %v3814_v63 }
 0x263   : > { %2336 = vst [vmem:[%s3907_s8 + $0x68] sm:$0xff] %v2304_v34  ;;  %v2180_v61 = vadd.f32 %v2179_v53, %v2091_v38 }
 0x265   : > { %v2238_v40 = vadd.f32 %v2180_v61, %v1720_v23 }
 0x267   : > { %v2273_v14 = vadd.f32 %v3900_v36, %v2238_v40 }
 0x268   : > { %v2003_v10 = vpop.f32.mrf.mxu2  ;;  %v2092_v56 = vpop.f32.mrf.mxu3 }
 0x269   : > { %v2305_v43 = vmax.f32 %v2273_v14, 0.0  ;;  %v2093_v31 = vadd.f32 %v2092_v56, %v2003_v10  ;;  %v1724_v58 = vpop.f32.mrf.mxu1  ;;  %v2184_v28 = vpop.f32.mrf.mxu0 }
 0x26a   : > { %v1725_v41 = vadd.f32 %v1724_v58, %v3817_v27 }
 0x26b   : > { %2337 = vst [vmem:[%s3907_s8 + $0x70] sm:$0xff] %v2305_v43  ;;  %v2182_v0 = vadd.f32 %v2181_v46, %v2093_v31 }
 0x26d   : > { %v2239_v44 = vadd.f32 %v2182_v0, %v1722_v15 }
 0x26f   : > { %v2274_v19 = vadd.f32 %v3900_v36, %v2239_v44 }
 0x270   : > { %v2006_v18 = vpop.f32.mrf.mxu2  ;;  %v2095_v45 = vpop.f32.mrf.mxu3 }
 0x271   : > { %v2306_v24 = vmax.f32 %v2274_v19, 0.0  ;;  %v2096_v22 = vadd.f32 %v2095_v45, %v2006_v18  ;;  %v1726_v8 = vpop.f32.mrf.mxu1  ;;  %v2186_v6 = vpop.f32.mrf.mxu0 }
 0x272   : > { %v1727_v52 = vadd.f32 %v1726_v8, %v3824_v16 }
 0x273   : > { %2338 = vst [vmem:[%s3907_s8 + $0x78] sm:$0xff] %v2306_v24  ;;  %v2185_v26 = vadd.f32 %v2184_v28, %v2096_v22 }
 0x275   : > { %v2240_v50 = vadd.f32 %v2185_v26, %v1725_v41 }
 0x277   : > { %v2275_v37 = vadd.f32 %v3900_v36, %v2240_v50 }
 0x278   : > { %v2008_v9 = vpop.f32.mrf.mxu2  ;;  %v2097_v63 = vpop.f32.mrf.mxu3 }
 0x279   : > { %v2307_v4 = vmax.f32 %v2275_v37, 0.0  ;;  %v2098_v11 = vadd.f32 %v2097_v63, %v2008_v9  ;;  %v1729_v30 = vpop.f32.mrf.mxu1  ;;  %v2189_v1 = vpop.f32.mrf.mxu0 }
 0x27a   : > { %v1730_v13 = vadd.f32 %v1729_v30, %v3827_v47 }
 0x27b   : > { %2339 = vst [vmem:[%s3907_s8 + $0x80] sm:$0xff] %v2307_v4  ;;  %v2187_v20 = vadd.f32 %v2186_v6, %v2098_v11 }
 0x27d   : > { %v2241_v29 = vadd.f32 %v2187_v20, %v1727_v52 }
 0x27f   : > { %v2276_v33 = vadd.f32 %v3900_v36, %v2241_v29 }
 0x280   : > { %v2011_v53 = vpop.f32.mrf.mxu2  ;;  %v2100_v27 = vpop.f32.mrf.mxu3 }
 0x281   : > { %v2308_v55 = vmax.f32 %v2276_v33, 0.0  ;;  %v2101_v25 = vadd.f32 %v2100_v27, %v2011_v53  ;;  %v1731_v21 = vpop.f32.mrf.mxu1  ;;  %v2191_v2 = vpop.f32.mrf.mxu0 }
 0x282   : > { %v1732_v61 = vadd.f32 %v1731_v21, %v3834_v35 }
 0x283   : > { %2340 = vst [vmem:[%s3907_s8 + $0x88] sm:$0xff] %v2308_v55  ;;  %v2190_v62 = vadd.f32 %v2189_v1, %v2101_v25 }
 0x285   : > { %v2242_v42 = vadd.f32 %v2190_v62, %v1730_v13 }
 0x287   : > { %v2277_v49 = vadd.f32 %v3900_v36, %v2242_v42 }
 0x288   : > { %v2013_v34 = vpop.f32.mrf.mxu2  ;;  %v2102_v16 = vpop.f32.mrf.mxu3 }
 0x289   : > { %v2309_v38 = vmax.f32 %v2277_v49, 0.0  ;;  %v2103_v39 = vadd.f32 %v2102_v16, %v2013_v34  ;;  %v1734_v46 = vpop.f32.mrf.mxu1  ;;  %v2194_v23 = vpop.f32.mrf.mxu0 }
 0x28a   : > { %v1735_v15 = vadd.f32 %v1734_v46, %v3837_v60 }
 0x28b   : > { %2341 = vst [vmem:[%s3907_s8 + $0x90] sm:$0xff] %v2309_v38  ;;  %v2192_v40 = vadd.f32 %v2191_v2, %v2103_v39 }
 0x28d   : > { %v2243_v14 = vadd.f32 %v2192_v40, %v1732_v61 }
 0x28f   : > { %v2278_v10 = vadd.f32 %v3900_v36, %v2243_v14 }
 0x290   : > { %v2016_v56 = vpop.f32.mrf.mxu2  ;;  %v2105_v47 = vpop.f32.mrf.mxu3 }
 0x291   : > { %v2310_v43 = vmax.f32 %v2278_v10, 0.0  ;;  %v2106_v31 = vadd.f32 %v2105_v47, %v2016_v56  ;;  %v1736_v58 = vpop.f32.mrf.mxu1  ;;  %v2196_v28 = vpop.f32.mrf.mxu0 }
 0x292   : > { %v1737_v6 = vadd.f32 %v1736_v58, %v3844_v51 }
 0x293   : > { %2342 = vst [vmem:[%s3907_s8 + $0x98] sm:$0xff] %v2310_v43  ;;  %v2195_v0 = vadd.f32 %v2194_v23, %v2106_v31 }
 0x295   : > { %v2244_v44 = vadd.f32 %v2195_v0, %v1735_v15 }
 0x297   : > { %v2279_v19 = vadd.f32 %v3900_v36, %v2244_v44 }
 0x298   : > { %v2018_v18 = vpop.f32.mrf.mxu2  ;;  %v2107_v35 = vpop.f32.mrf.mxu3 }
 0x299   : > { %v2311_v45 = vmax.f32 %v2279_v19, 0.0  ;;  %v2108_v24 = vadd.f32 %v2107_v35, %v2018_v18  ;;  %v1739_v22 = vpop.f32.mrf.mxu1  ;;  %v2199_v8 = vpop.f32.mrf.mxu0 }
 0x29a   : > { %v1740_v30 = vadd.f32 %v1739_v22, %v3847_v59 }
 0x29b   : > { %2343 = vst [vmem:[%s3907_s8 + $0xa0] sm:$0xff] %v2311_v45  ;;  %v2197_v41 = vadd.f32 %v2196_v28, %v2108_v24 }
 0x29d   : > { %v2245_v26 = vadd.f32 %v2197_v41, %v1737_v6 }
 0x29f   : > { %v2280_v50 = vadd.f32 %v3900_v36, %v2245_v26 }
 0x2a0   : > { %v2021_v37 = vpop.f32.mrf.mxu2  ;;  %v2110_v60 = vpop.f32.mrf.mxu3 }
 0x2a1   : > { %v2312_v9 = vmax.f32 %v2280_v50, 0.0  ;;  %v2111_v63 = vadd.f32 %v2110_v60, %v2021_v37  ;;  %v1741_v4 = vpop.f32.mrf.mxu1  ;;  %v2201_v11 = vpop.f32.mrf.mxu0 }
 0x2a2   : > { %v1742_v25 = vadd.f32 %v1741_v4, %v3854_v48 }
 0x2a3   : > { %2344 = vst [vmem:[%s3907_s8 + $0xa8] sm:$0xff] %v2312_v9  ;;  %v2200_v1 = vadd.f32 %v2199_v8, %v2111_v63 }
 0x2a5   : > { %v2246_v52 = vadd.f32 %v2200_v1, %v1740_v30 }
 0x2a7   : > { %v2281_v20 = vadd.f32 %v3900_v36, %v2246_v52 }
 0x2a8   : > { %v2023_v29 = vpop.f32.mrf.mxu2  ;;  %v2112_v51 = vpop.f32.mrf.mxu3 }
 0x2a9   : > { %v2313_v33 = vmax.f32 %v2281_v20, 0.0  ;;  %v2113_v53 = vadd.f32 %v2112_v51, %v2023_v29  ;;  %v1744_v27 = vpop.f32.mrf.mxu1  ;;  %v2204_v55 = vpop.f32.mrf.mxu0 }
 0x2aa   : > { %v1745_v38 = vadd.f32 %v1744_v27, %v3857_v54 }
 0x2ab   : > { %2345 = vst [vmem:[%s3907_s8 + $0xb0] sm:$0xff] %v2313_v33  ;;  %v2202_v21 = vadd.f32 %v2201_v11, %v2113_v53 }
 0x2ad   : > { %v2247_v2 = vadd.f32 %v2202_v21, %v1742_v25 }
 0x2af   : > { %v2282_v13 = vadd.f32 %v3900_v36, %v2247_v2 }
 0x2b0   : > { %v2026_v62 = vpop.f32.mrf.mxu2  ;;  %v2115_v59 = vpop.f32.mrf.mxu3 }
 0x2b1   : > { %v2314_v42 = vmax.f32 %v2282_v13, 0.0  ;;  %v2116_v49 = vadd.f32 %v2115_v59, %v2026_v62  ;;  %v1746_v34 = vpop.f32.mrf.mxu1  ;;  %v2206_v16 = vpop.f32.mrf.mxu0 }
 0x2b2   : > { %v1747_v47 = vadd.f32 %v1746_v34, %v3864_v5 }
 0x2b3   : > { %2346 = vst [vmem:[%s3907_s8 + $0xb8] sm:$0xff] %v2314_v42  ;;  %v2205_v39 = vadd.f32 %v2204_v55, %v2116_v49 }
 0x2b5   : > { %v2248_v46 = vadd.f32 %v2205_v39, %v1745_v38 }
 0x2b7   : > { %v2283_v23 = vadd.f32 %v3900_v36, %v2248_v46 }
 0x2b8   : > { %v2028_v61 = vpop.f32.mrf.mxu2  ;;  %v2117_v48 = vpop.f32.mrf.mxu3 }
 0x2b9   : > { %v2315_v40 = vmax.f32 %v2283_v23, 0.0  ;;  %v2118_v14 = vadd.f32 %v2117_v48, %v2028_v61  ;;  %v1749_v10 = vpop.f32.mrf.mxu1  ;;  %v2209_v56 = vpop.f32.mrf.mxu0 }
 0x2ba   : > { %v1750_v18 = vadd.f32 %v1749_v10, %v3867_v7 }
 0x2bb   : > { %2347 = vst [vmem:[%s3907_s8 + $0xc0] sm:$0xff] %v2315_v40  ;;  %v2207_v43 = vadd.f32 %v2206_v16, %v2118_v14 }
 0x2bd   : > { %v2249_v31 = vadd.f32 %v2207_v43, %v1747_v47 }
 0x2bf   : > { %v2284_v58 = vadd.f32 %v3900_v36, %v2249_v31 }
 0x2c0   : > { %v2031_v28 = vpop.f32.mrf.mxu2  ;;  %v2120_v54 = vpop.f32.mrf.mxu3 }
 0x2c1   : > { %v2316_v15 = vmax.f32 %v2284_v58, 0.0  ;;  %v2121_v0 = vadd.f32 %v2120_v54, %v2031_v28  ;;  %v1751_v44 = vpop.f32.mrf.mxu1  ;;  %v2211_v19 = vpop.f32.mrf.mxu0 }
 0x2c2   : > { %v1752_v26 = vadd.f32 %v1751_v44, %v3874_v12 }
 0x2c3   : > { %2348 = vst [vmem:[%s3907_s8 + $0xc8] sm:$0xff] %v2316_v15  ;;  %v2210_v35 = vadd.f32 %v2209_v56, %v2121_v0 }
 0x2c5   : > { %v2250_v45 = vadd.f32 %v2210_v35, %v1750_v18 }
 0x2c7   : > { %v2285_v24 = vadd.f32 %v3900_v36, %v2250_v45 }
 0x2c8   : > { %v2033_v5 = vpop.f32.mrf.mxu2  ;;  %v2122_v22 = vpop.f32.mrf.mxu3 }
 0x2c9   : > { %v2317_v8 = vmax.f32 %v2285_v24, 0.0  ;;  %v2123_v6 = vadd.f32 %v2122_v22, %v2033_v5  ;;  %v1754_v41 = vpop.f32.mrf.mxu1  ;;  %v2214_v37 = vpop.f32.mrf.mxu0 }
 0x2ca   : > { %v1755_v30 = vadd.f32 %v1754_v41, %v3877_v3 }
 0x2cb   : > { %2349 = vst [vmem:[%s3907_s8 + $0xd0] sm:$0xff] %v2317_v8  ;;  %v2212_v50 = vadd.f32 %v2211_v19, %v2123_v6 }
 0x2cd   : > { %v2251_v60 = vadd.f32 %v2212_v50, %v1752_v26 }
 0x2cf   : > { %v2286_v9 = vadd.f32 %v3900_v36, %v2251_v60 }
 0x2d0   : > { %v2036_v7 = vpop.f32.mrf.mxu2  ;;  %v2125_v63 = vpop.f32.mrf.mxu3 }
 0x2d1   : > { %v2318_v4 = vmax.f32 %v2286_v9, 0.0  ;;  %v2126_v11 = vadd.f32 %v2125_v63, %v2036_v7  ;;  %v1756_v52 = vpop.f32.mrf.mxu1  ;;  %v2216_v29 = vpop.f32.mrf.mxu0 }
 0x2d2   : > { %v1757_v55 = vadd.f32 %v1756_v52, %v3884_v57 }
 0x2d3   : > { %2350 = vst [vmem:[%s3907_s8 + $0xd8] sm:$0xff] %v2318_v4  ;;  %v2215_v1 = vadd.f32 %v2214_v37, %v2126_v11 }
 0x2d5   : > { %v2252_v20 = vadd.f32 %v2215_v1, %v1755_v30 }
 0x2d7   : > { %v2287_v51 = vadd.f32 %v3900_v36, %v2252_v20 }
 0x2d8   : > { %v2038_v12 = vpop.f32.mrf.mxu2  ;;  %v2127_v33 = vpop.f32.mrf.mxu3 }
 0x2d9   : > { %v2319_v53 = vmax.f32 %v2287_v51, 0.0  ;;  %v2128_v27 = vadd.f32 %v2127_v33, %v2038_v12  ;;  %v1759_v2 = vpop.f32.mrf.mxu1  ;;  %v2219_v3 = vpop.f32.mrf.mxu0 }
 0x2da   : > { %v1760_v34 = vadd.f32 %v1759_v2, %v3887_v17 }
 0x2db   : > { %2351 = vst [vmem:[%s3907_s8 + $0xe0] sm:$0xff] %v2319_v53  ;;  %v2217_v25 = vadd.f32 %v2216_v29, %v2128_v27 }
 0x2dd   : > { %v2253_v21 = vadd.f32 %v2217_v25, %v1757_v55 }
 0x2df   : > { %v2288_v13 = vadd.f32 %v3900_v36, %v2253_v21 }
 0x2e0   : > { %v2041_v62 = vpop.f32.mrf.mxu2  ;;  %v2130_v59 = vpop.f32.mrf.mxu3 }
 0x2e1   : > { %v2320_v42 = vmax.f32 %v2288_v13, 0.0  ;;  %v2131_v49 = vadd.f32 %v2130_v59, %v2041_v62  ;;  %v1761_v57 = vpop.f32.mrf.mxu1  ;;  %v2221_v40 = vpop.f32.mrf.mxu0 }
 0x2e2   : > { %v1762_v14 = vadd.f32 %v1761_v57, %v3894_v32 }
 0x2e3   : > { %2352 = vst [vmem:[%s3907_s8 + $0xe8] sm:$0xff] %v2320_v42  ;;  %v2220_v16 = vadd.f32 %v2219_v3, %v2131_v49 }
 0x2e5   : > { %v2254_v38 = vadd.f32 %v2220_v16, %v1760_v34 }
 0x2e7   : > { %v2289_v39 = vadd.f32 %v3900_v36, %v2254_v38 }
 0x2e8   : > { %v2043_v46 = vpop.f32.mrf.mxu2  ;;  %v2132_v23 = vpop.f32.mrf.mxu3 }
 0x2e9   : > { %v2321_v61 = vmax.f32 %v2289_v39, 0.0  ;;  %v2133_v48 = vadd.f32 %v2132_v23, %v2043_v46 }
 0x2eb   : > { %2353 = vst [vmem:[%s3907_s8 + $0xf0] sm:$0xff] %v2321_v61  ;;  %v2222_v10 = vadd.f32 %v2221_v40, %v2133_v48 }
 0x2ed   : > { %v2255_v56 = vadd.f32 %v2222_v10, %v1762_v14 }
 0x2ef   : > { %v2290_v47 = vadd.f32 %v3900_v36, %v2255_v56 }
 0x2f1   : > { %v2322_v43 = vmax.f32 %v2290_v47, 0.0 }
 0x2f3   : > { %2354 = vst [vmem:[%s3907_s8 + $0xf8] sm:$0xff] %v2322_v43 }
 0x2f4 PF: > { %s14_s17 = sadd.s32 1, %s3121_s17   ;;  %s4111_s15 = smov %s3117_s16 }
 0x2f5   : > { %p11_p5 = scmp.ge.s32.totalorder %s14_s17, 4   ;;  %s4112_s16 = smov %s4114_s18 }
 0x2f7   :  { %13 = sbr.rel (!%p11_p5) target bundleno = 2 (0x2), region = 71 }

</bundles_post_ra>
